<compile_context>
chip_gen: v6e
topology: v6e:2x2x1
jax: 0.10.0
libtpu: 0.0.40
codegen_flags: <defaults>
</compile_context>

<pallas_src>
import functools

import jax
import jax.numpy as jnp
import numpy as np
from jax.experimental import pallas as pl
from jax.experimental.pallas import tpu as pltpu


def _maxpool_flatten_kernel(x_ref, sel_ref, o_ref):
    # x_ref:   (BT*8, 512)  one row = 8 channels of one image,
    #          lane l = (c % 8) * 64 + h * 8 + w
    # sel_ref: (512, 128)   constant 0/1 selection matrix (resident in VMEM)
    # o_ref:   (BT*8, 128)  same 8 channels pooled, lane m = (c%8)*16 + ho*4 + wo
    #          (exactly torch's NCHW view(-1, 1024) element order)
    x = x_ref[...]

    # 2x2 / stride-2 max pool, entirely along the lane axis (XLU vrot + VPU max):
    #   W partner is 1 lane to the right, H partner is 8 lanes to the right.
    #   shift=511 / 504 are the positive-mod equivalents of -1 / -8 on 512 lanes.
    m = jnp.maximum(x, pltpu.roll(x, shift=511, axis=1))   # max over the W pair
    m = jnp.maximum(m, pltpu.roll(m, shift=504, axis=1))   # max over the H pair
    # Valid pooled values now sit at lanes src = (c%8)*64 + 16*ho + 2*wo.

    # Compact 512 -> 128 lanes with the precomputed 0/1 selection matrix on the
    # (otherwise idle) MXU.  HIGHEST precision keeps the f32 passthrough exact.
    z = jnp.dot(
        m,
        sel_ref[...],
        preferred_element_type=jnp.float32,
        precision=jax.lax.Precision.HIGHEST,
    )
    o_ref[...] = z.astype(o_ref.dtype)


@functools.lru_cache(maxsize=None)
def _selection_matrix_np():
    # sel[l, m] = 1 iff l == (m//16)*64 + ((m%16)//4)*16 + (m%4)*2
    lane = np.arange(512, dtype=np.int64)[:, None]
    col = np.arange(128, dtype=np.int64)[None, :]
    src = (col // 16) * 64 + ((col % 16) // 4) * 16 + (col % 4) * 2
    return (lane == src)


def layer3_forward(x_nchw, *, batch_tile=512):
    """MaxPool2d(2) + view(-1, 4*4*64) for NCHW input of shape (N, 64, 8, 8)."""
    n, c, h, w = x_nchw.shape
    assert (c, h, w) == (64, 8, 8), "layer3 expects input of shape (N, 64, 8, 8)"

    bt = min(batch_tile, n)
    # v7x megacore: ("parallel",) can only split the batch axis across the two
    # TensorCores if the grid has >= 2 steps; split big single-step batches.
    if n > 8 and pl.cdiv(n, bt) < 2:
        bt = pl.cdiv(n, 2)
    grid = (pl.cdiv(n, bt),)

    # Free (metadata-only) reshape: (N, 64, 8, 8) -> (N*8, 512).
    x_rows = x_nchw.reshape(n * 8, 8 * 8 * 8)
    # Precomputed selection matrix, same dtype as the activations (exact 0/1).
    sel = jnp.asarray(_selection_matrix_np(), dtype=x_nchw.dtype)

    out_rows = pl.pallas_call(
        _maxpool_flatten_kernel,
        out_shape=jax.ShapeDtypeStruct((n * 8, 128), x_nchw.dtype),
        grid=grid,
        in_specs=[
            pl.BlockSpec((bt * 8, 512), lambda i: (i, 0)),
            # Constant block index -> DMA'd once, stays resident across steps.
            pl.BlockSpec((512, 128), lambda i: (0, 0)),
        ],
        out_specs=pl.BlockSpec((bt * 8, 128), lambda i: (i, 0)),
        compiler_params=pltpu.CompilerParams(
            dimension_semantics=("parallel",),   # batch axis -> both TCs on v7x
            vmem_limit_bytes=32 * 1024 * 1024,   # ~20.5 MiB used at BT=512 f32
        ),
    )(x_rows, sel)

    # Free reshape back: rows are already in torch's view(-1, 1024) order.
    return out_rows.reshape(n, 4 * 4 * 64)


if __name__ == "__main__":
    key = jax.random.PRNGKey(0)
    # Shapes are forced by the module: the hard-coded view(-1, 4*4*64) implies
    # (N, 64, 8, 8) input.  Use a small batch of 2.
    x = jax.random.normal(key, (2, 64, 8, 8), dtype=jnp.float32)

    out = jax.block_until_ready(layer3_forward(x))

    # Plain-JAX reference (MaxPool2d(2) + flatten in NCHW order).
    ref = jax.lax.reduce_window(
        x, -jnp.inf, jax.lax.max,
        window_dimensions=(1, 1, 2, 2),
        window_strides=(1, 1, 2, 2),
        padding="VALID",
    ).reshape(-1, 4 * 4 * 64)

    assert out.shape == (2, 4 * 4 * 64)
    assert jnp.allclose(out, ref, rtol=1e-5, atol=1e-5), "Pallas maxpool mismatch"
    print("KERNEL_OK")
</pallas_src>

<mosaic_0001>
module attributes {stable_mosaic.version = 11 : i64} {
  func.func @_maxpool_flatten_kernel(%arg0: i32, %arg1: memref<16x512xf32, #tpu.memory_space<vmem>>, %arg2: memref<512x128xf32, #tpu.memory_space<vmem>>, %arg3: memref<16x128xf32, #tpu.memory_space<vmem>>) attributes {dimension_semantics = [#tpu.dimension_semantics<parallel>], iteration_bounds = array<i64: 1>, scalar_prefetch = 0 : i64, scratch_operands = 0 : i64, tpu.core_type = #tpu.core_type<tc>, window_params = [{transform_indices = @transform_0, window_bounds = array<i64: 16, 512>}, {pipeline_mode = #tpu.pipeline_mode<synchronous>, transform_indices = @transform_1, window_bounds = array<i64: 512, 128>}, {transform_indices = @transform_2, window_bounds = array<i64: 16, 128>}]} {
    %c0 = arith.constant 0 : index
    %c0_0 = arith.constant 0 : index
    %0 = vector.load %arg1[%c0, %c0_0] : memref<16x512xf32, #tpu.memory_space<vmem>>, vector<16x512xf32>
    %c511_i32 = arith.constant 511 : i32
    %1 = tpu.dynamic_rotate %0 by %c511_i32 dim 1 : vector<16x512xf32>, i32 -> vector<16x512xf32>
    %2 = arith.maximumf %0, %1 : vector<16x512xf32>
    %c504_i32 = arith.constant 504 : i32
    %3 = tpu.dynamic_rotate %2 by %c504_i32 dim 1 : vector<16x512xf32>, i32 -> vector<16x512xf32>
    %4 = arith.maximumf %2, %3 : vector<16x512xf32>
    %c0_1 = arith.constant 0 : index
    %c0_2 = arith.constant 0 : index
    %5 = vector.load %arg2[%c0_1, %c0_2] : memref<512x128xf32, #tpu.memory_space<vmem>>, vector<512x128xf32>
    %cst = arith.constant dense<0.000000e+00> : vector<16x128xf32>
    %6 = tpu.matmul %4, %5, %cst {dimension_numbers = #tpu.dot_dimension_numbers<[1], [0], [0], [1], [0, 0, 1, 1], [], []>, precision = #tpu.contract_precision<fp32>} : vector<16x512xf32>, vector<512x128xf32>, vector<16x128xf32> -> vector<16x128xf32>
    %c0_3 = arith.constant 0 : index
    %c0_4 = arith.constant 0 : index
    %7 = vector.load %arg3[%c0_3, %c0_4] : memref<16x128xf32, #tpu.memory_space<vmem>>, vector<16x128xf32>
    tpu.vector_store %arg3[%c0_3, %c0_4], %6 {strides = array<i32>} : memref<16x128xf32, #tpu.memory_space<vmem>>, vector<16x128xf32>,
    return
  }
  func.func @transform_0(%arg0: i32) -> (i32, i32) {
    %c0_i32 = arith.constant 0 : i32
    %c0_i32_0 = arith.constant 0 : i32
    return %arg0, %c0_i32 : i32, i32
  }
  func.func @transform_1(%arg0: i32) -> (i32, i32) {
    %c0_i32 = arith.constant 0 : i32
    %c0_i32_0 = arith.constant 0 : i32
    %c0_i32_1 = arith.constant 0 : i32
    return %c0_i32, %c0_i32_0 : i32, i32
  }
  func.func @transform_2(%arg0: i32) -> (i32, i32) {
    %c0_i32 = arith.constant 0 : i32
    %c0_i32_0 = arith.constant 0 : i32
    return %arg0, %c0_i32 : i32, i32
  }
}

</mosaic_0001>

<bundles_post_ra>
// kernel: tpu_custom_call.1
= control target key start
LH: loop header
LB: loop body
LE: loop exit
PB: predicated region body
PF: predicated region fallthrough
CT: control target
= control target key end

     0   :  { %7 = vsyncpa [#allocation3], 0  ;;  %s3829_s0 = inlined_call_operand.hbm [shape: f32[16,512], index: 0, kind: input, shape index: {}]   ;;  %s3830_s1 = inlined_call_operand.hbm [shape: f32[512,128], index: 1, kind: input, shape index: {}]   ;;  %s3831_s2 = inlined_call_operand.hbm [shape: f32[16,128], index: 2, kind: output, shape index: {}]  }
   0x1   :  { %8 = vsyncpa [#allocation6], 0 }
   0x2   :  { %9 = vsyncpa [#allocation4], 0  ;;  %s2567_s9 = smov [#allocation2]  }
   0x3   :  { %s15_s10 = sshll.u32 %s2567_s9, 4  ;;  %s16_s10 = int_to_ptr.vmem [resolvable:$true] %s15_s10 }
   0x4   :  { %s2509_s11 = scalar_lea.vmem %s16_s10, 1024  ;;  %p2514_p1 = scmp.lt.s32.totalorder %s16_s10, %s16_s10 }
   0x5   :  { %p2510_p0 = scmp.ne.s32.totalorder %s16_s10, %s2509_s11  ;;  %p2515_p2 = scmp.lt.s32.totalorder %s2509_s11, %s2509_s11 }
   0x7   :  { %p2516_p3 = por %p2515_p2, %p2514_p1 }
   0x9   :  { %p2517_p4 = pnand %p2516_p3, %p2510_p0 }
   0xb   :  { %2520 = shalt.err (!%p2517_p4)
}
   0xc   :  { %s2568_s12 = smov 512   ;;  %s2569_s13 = smov 32  }
   0xd   :  { %21 = dma.hbm_to_vmem [thread:$0]  %s3829_s0, 1024, %s16_s10, [#allocation3], %s2568_s12, %s2568_s12, %s2569_s13  }
   0xe   :  { %s2570_s16 = smov [#allocation5]  }
   0xf   :  { %s27_s17 = sshll.u32 %s2570_s16, 4  ;;  %s28_s17 = int_to_ptr.vmem [resolvable:$true] %s27_s17 }
  0x10   :  { %s2529_s18 = scalar_lea.vmem %s28_s17, 8192  ;;  %p2534_p6 = scmp.lt.s32.totalorder %s28_s17, %s28_s17 }
  0x11   :  { %p2530_p5 = scmp.ne.s32.totalorder %s28_s17, %s2529_s18  ;;  %p2535_p7 = scmp.lt.s32.totalorder %s2529_s18, %s2529_s18 }
  0x13   :  { %p2536_p8 = por %p2535_p7, %p2534_p6 }
  0x15   :  { %p2537_p9 = pnand %p2536_p8, %p2530_p5 }
  0x17   :  { %2540 = shalt.err (!%p2537_p9)
}
  0x18   :  { %s2571_s19 = smov 128   ;;  %s2572_s20 = smov 8  }
  0x19   :  { %33 = dma.hbm_to_vmem [thread:$0]  %s3830_s1, 8192, %s28_s17, [#allocation6], %s2571_s19, %s2571_s19, %s2572_s20  }
  0x1a   :  { %2561 = dma.done.wait [#allocation3], 1024  }
  0x1b   :  { %2562 = vsyncadd [#allocation3], 4294966272 }
  0x1c   :  { %2563 = dma.done.wait [#allocation6], 8192  }
  0x1d   :  { %2564 = vsyncadd [#allocation6], 4294959104  ;;  %v2600_v0 = vld [vmem:[#allocation2 + $0x18] sm:$0xff]  ;;  %v2602_v1 = vld [vmem:[#allocation2 + $0x8] sm:$0xff]  ;;  %s2573_s0 = smov 127   ;;  %s2574_s1 = smov 120  }
  0x1e   :  { %60 = vrot.lane.b32.xlu1 %v2600_v0, %s2573_s0  ;;  %52 = vrot.lane.b32.xlu0 %v2602_v1, %s2573_s0  ;;  %v2608_v2 = vld [vmem:[#allocation2 + $0x10] sm:$0xff]  ;;  %v2610_v3 = vld [vmem:[#allocation2] sm:$0xff]  ;;  %v2616_v4 = vld [vmem:[#allocation2 + $0x28] sm:$0xff]  ;;  %s2575_s23 = smov [#allocation7]  }
  0x1f   :  { %v2618_v5 = vld [vmem:[#allocation2 + $0x30] sm:$0xff]  ;;  %v147_v6 = vld [vmem:[#allocation5 + $0xf8] sm:$0xff]  ;;  %v145_v13 = vld [vmem:[#allocation5 + $0xe8] sm:$0xff]  ;;  %s2023_s24 = sshll.u32 %s2575_s23, 4  ;;  %s2024_s24 = int_to_ptr.vmem [resolvable:$true] %s2023_s24 }
  0x20   :  { %v131_v7 = vld [vmem:[#allocation5 + $0x78] sm:$0xff]  ;;  %v146_v8 = vld [vmem:[#allocation5 + $0xf0] sm:$0xff]  ;;  %v2620_v9 = vand.u32 4294901760, %v147_v6  ;;  %v129_v14 = vld [vmem:[#allocation5 + $0x68] sm:$0xff]  ;;  %v2632_v16 = vand.u32 4294901760, %v145_v13  ;;  %s2541_s25 = scalar_lea.vmem %s2024_s24, 256  ;;  %p2546_p11 = scmp.lt.s32.totalorder %s2024_s24, %s2024_s24 }
  0x21   :  { %v2622_v10 = vand.u32 4294901760, %v131_v7  ;;  %v2624_v11 = vand.u32 4294901760, %v146_v8  ;;  %v130_v12 = vld [vmem:[#allocation5 + $0x70] sm:$0xff]  ;;  %v2634_v17 = vand.u32 4294901760, %v129_v14  ;;  %v144_v18 = vld [vmem:[#allocation5 + $0xe0] sm:$0xff]  ;;  %v2636_v20 = vld [vmem:[#allocation2 + $0x38] sm:$0xff]  ;;  %p2542_p10 = scmp.ne.s32.totalorder %s2024_s24, %s2541_s25  ;;  %p2547_p12 = scmp.lt.s32.totalorder %s2541_s25, %s2541_s25 }
  0x22   :  { %56 = vrot.lane.b32.xlu0 %v2608_v2, %s2573_s0  ;;  %48 = vrot.lane.b32.xlu1 %v2610_v3, %s2573_s0  ;;  %v2630_v15 = vand.u32 4294901760, %v130_v12  ;;  %v128_v19 = vld [vmem:[#allocation5 + $0x60] sm:$0xff]  ;;  %v2641_v22 = vsub.f32 %v147_v6, %v2620_v9  ;;  %v2649_v25 = vand.u32 4294901760, %v144_v18  ;;  %v2656_v27 = vsub.f32 %v145_v13, %v2632_v16  ;;  %v143_v46 = vld [vmem:[#allocation5 + $0xd8] sm:$0xff]  ;;  %v142_v48 = vld [vmem:[#allocation5 + $0xd0] sm:$0xff] }
  0x23   :  { %v2638_v21 = vld [vmem:[#allocation2 + $0x20] sm:$0xff]  ;;  %v2644_v23 = vsub.f32 %v131_v7, %v2622_v10  ;;  %v2647_v24 = vsub.f32 %v146_v8, %v2624_v11  ;;  %2036 = vmatprep.subr.mxu0 %v2620_v9  ;;  %v2659_v28 = vsub.f32 %v129_v14, %v2634_v17  ;;  %v2661_v29 = vand.u32 4294901760, %v128_v19  ;;  %v127_v47 = vld [vmem:[#allocation5 + $0x58] sm:$0xff]  ;;  %v126_v53 = vld [vmem:[#allocation5 + $0x50] sm:$0xff]  ;;  %p2548_p13 = por %p2547_p12, %p2546_p11 }
  0x24   :  { %3986 = vst [vmem:[#allocation11_spill] sm:$0xff] %v2641_v22  ;;  %v2653_v26 = vsub.f32 %v130_v12, %v2630_v15  ;;  %2037 = vmatpush3.msra.mxu0 %v2622_v10  ;;  %v3846_v30 = vand.u32 4294901760, %v2641_v22  ;;  %v2668_v33 = vsub.f32 %v144_v18, %v2649_v25  ;;  %v3841_v35 = vand.u32 4294901760, %v2656_v27  ;;  %v141_v54 = vld [vmem:[#allocation5 + $0xc8] sm:$0xff]  ;;  %v140_v60 = vld [vmem:[#allocation5 + $0xc0] sm:$0xff] }
  0x25   :  { %v3844_v31 = vand.u32 4294901760, %v2644_v23  ;;  %v3843_v32 = vand.u32 4294901760, %v2647_v24  ;;  %2038 = vmatprep.subr.mxu0 %v2624_v11  ;;  %v3839_v36 = vand.u32 4294901760, %v2659_v28  ;;  %v2679_v37 = vsub.f32 %v128_v19, %v2661_v29  ;;  %v125_v55 = vld [vmem:[#allocation5 + $0x48] sm:$0xff]  ;;  %v124_v7 = vld [vmem:[#allocation5 + $0x40] sm:$0xff]  ;;  %p2549_p0 = pnand %p2548_p13, %p2542_p10 }
  0x26   :  { %54 = vrot.lane.b32.xlu0 %v2616_v4, %s2573_s0  ;;  %58 = vrot.lane.b32.xlu1 %v2618_v5, %s2573_s0  ;;  %v3842_v34 = vand.u32 4294901760, %v2653_v26  ;;  %v423_v38 = vsub.f32 %v2641_v22, %v3846_v30  ;;  %v3837_v41 = vand.u32 4294901760, %v2668_v33  ;;  %v437_v43 = vsub.f32 %v2656_v27, %v3841_v35  ;;  %v120_v30 = vld [vmem:[#allocation5 + $0x20] sm:$0xff] }
  0x27   :  { %v311_v39 = vsub.f32 %v2644_v23, %v3844_v31  ;;  %v430_v40 = vsub.f32 %v2647_v24, %v3843_v32  ;;  %2039 = vmatpush3.msra.mxu0 %v2630_v15  ;;  %v325_v44 = vsub.f32 %v2659_v28, %v3839_v36  ;;  %v3835_v45 = vand.u32 4294901760, %v2679_v37  ;;  %v121_v36 = vld [vmem:[#allocation5 + $0x28] sm:$0xff]  ;;  %v136_v31 = vld [vmem:[#allocation5 + $0xa0] sm:$0xff] }
  0x28   :  { %v318_v42 = vsub.f32 %v2653_v26, %v3842_v34  ;;  %2040 = vmatprep.subr.mxu0 %v2632_v16  ;;  %v424_v49 = vand.u32 4294901760, %v423_v38  ;;  %v444_v52 = vsub.f32 %v2668_v33, %v3837_v41  ;;  %v438_v57 = vand.u32 4294901760, %v437_v43  ;;  %v122_v41 = vld [vmem:[#allocation5 + $0x30] sm:$0xff] }
  0x29   :  { %v312_v50 = vand.u32 4294901760, %v311_v39  ;;  %v431_v51 = vand.u32 4294901760, %v430_v40  ;;  %2041 = vmatpush3.msra.mxu0 %v2634_v17  ;;  %v326_v58 = vand.u32 4294901760, %v325_v44  ;;  %v332_v59 = vsub.f32 %v2679_v37, %v3835_v45 }
  0x2a   :  { %62 = vrot.lane.b32.xlu0 %v2636_v20, %s2573_s0  ;;  %50 = vrot.lane.b32.xlu1 %v2638_v21, %s2573_s0  ;;  %v319_v56 = vand.u32 4294901760, %v318_v42  ;;  %v445_v61 = vand.u32 4294901760, %v444_v52  ;;  %v2711_v62 = vand.u32 4294901760, %v143_v46  ;;  %v2713_v63 = vand.u32 4294901760, %v127_v47 }
  0x2b   :  { %2042 = vmatprep.subr.mxu0 %v2649_v25  ;;  %2074 = vmatprep.subr.mxu1 %v424_v49  ;;  %v2715_v6 = vand.u32 4294901760, %v142_v48  ;;  %v333_v8 = vand.u32 4294901760, %v332_v59  ;;  %v2718_v12 = vand.u32 4294901760, %v126_v53  ;;  %v2720_v13 = vand.u32 4294901760, %v141_v54 }
  0x2c   :  { %2043 = vmatpush3.msra.mxu0 %v2661_v29  ;;  %2075 = vmatpush3.msra.mxu1 %v312_v50  ;;  %v2722_v14 = vand.u32 4294901760, %v125_v55  ;;  %v2725_v18 = vsub.f32 %v143_v46, %v2711_v62  ;;  %v2728_v19 = vsub.f32 %v127_v47, %v2713_v63  ;;  %v2733_v39 = vand.u32 4294901760, %v140_v60 }
  0x2d   :  { %2076 = vmatprep.subr.mxu1 %v431_v51  ;;  %v2731_v38 = vsub.f32 %v142_v48, %v2715_v6  ;;  %2044 = vmatprep.subr.mxu0 %v2711_v62  ;;  %v2737_v40 = vsub.f32 %v126_v53, %v2718_v12  ;;  %v2740_v42 = vsub.f32 %v141_v54, %v2720_v13  ;;  %v2745_v44 = vand.u32 4294901760, %v124_v7 }
  0x2e   :  { %2077 = vmatpush3.msra.mxu1 %v319_v56  ;;  %v2743_v43 = vsub.f32 %v125_v55, %v2722_v14  ;;  %2045 = vmatpush3.msra.mxu0 %v2713_v63  ;;  %v3834_v46 = vand.u32 4294901760, %v2725_v18  ;;  %v3833_v47 = vand.u32 4294901760, %v2728_v19  ;;  %v2752_v49 = vsub.f32 %v140_v60, %v2733_v39 }
  0x2f   :  { %2078 = vmatprep.subr.mxu1 %v438_v57  ;;  %v3832_v48 = vand.u32 4294901760, %v2731_v38  ;;  %2046 = vmatprep.subr.mxu0 %v2715_v6  ;;  %v3836_v50 = vand.u32 4294901760, %v2737_v40  ;;  %v3838_v51 = vand.u32 4294901760, %v2740_v42  ;;  %v2759_v53 = vsub.f32 %v124_v7, %v2745_v44  ;;  %v139_v7 = vld [vmem:[#allocation5 + $0xb8] sm:$0xff] }
  0x30   :  { %3987 = vst [vmem:[#allocation12_spill] sm:$0xff] %v2743_v43  ;;  %3988 = vst [vmem:[#allocation13_spill] sm:$0xff] %v2752_v49  ;;  %2079 = vmatpush3.msra.mxu1 %v326_v58  ;;  %v3840_v52 = vand.u32 4294901760, %v2743_v43  ;;  %2047 = vmatpush3.msra.mxu0 %v2718_v12  ;;  %v451_v54 = vsub.f32 %v2725_v18, %v3834_v46  ;;  %v339_v55 = vsub.f32 %v2728_v19, %v3833_v47  ;;  %v138_v47 = vld [vmem:[#allocation5 + $0xb0] sm:$0xff] }
  0x31   :  { %3989 = vst [vmem:[#allocation14_spill] sm:$0xff] %v2759_v53  ;;  %2080 = vmatprep.subr.mxu1 %v445_v61  ;;  %v458_v56 = vsub.f32 %v2731_v38, %v3832_v48  ;;  %v3845_v57 = vand.u32 4294901760, %v2752_v49  ;;  %2048 = vmatprep.subr.mxu0 %v2720_v13  ;;  %v346_v58 = vsub.f32 %v2737_v40, %v3836_v50  ;;  %v3849_v61 = vand.u32 4294901760, %v2759_v53  ;;  %v123_v48 = vld [vmem:[#allocation5 + $0x38] sm:$0xff] }
  0x32   :  { %2081 = vmatpush3.msra.mxu1 %v333_v8  ;;  %v465_v59 = vsub.f32 %v2740_v42, %v3838_v51  ;;  %v353_v60 = vsub.f32 %v2743_v43, %v3840_v52  ;;  %2049 = vmatpush3.msra.mxu0 %v2722_v14  ;;  %v452_v8 = vand.u32 4294901760, %v451_v54  ;;  %v340_v46 = vand.u32 4294901760, %v339_v55  ;;  %v137_v51 = vld [vmem:[#allocation5 + $0xa8] sm:$0xff] }
  0x33   :  { %v459_v45 = vand.u32 4294901760, %v458_v56  ;;  %v472_v50 = vsub.f32 %v2752_v49, %v3845_v57  ;;  %2050 = vmatprep.subr.mxu0 %v2733_v39  ;;  %v347_v52 = vand.u32 4294901760, %v346_v58  ;;  %v360_v32 = vsub.f32 %v2759_v53, %v3849_v61 }
  0x34   :  { %v466_v35 = vand.u32 4294901760, %v465_v59  ;;  %v354_v34 = vand.u32 4294901760, %v353_v60  ;;  %2051 = vmatpush3.msra.mxu0 %v2745_v44  ;;  %2082 = vmatprep.subr.mxu1 %v452_v8  ;;  %v2792_v55 = vand.u32 4294901760, %v139_v7  ;;  %v2794_v56 = vand.u32 4294901760, %v123_v48 }
  0x35   :  { %v473_v54 = vand.u32 4294901760, %v472_v50  ;;  %v2796_v57 = vand.u32 4294901760, %v138_v47  ;;  %2083 = vmatpush3.msra.mxu1 %v340_v46  ;;  %v361_v58 = vand.u32 4294901760, %v360_v32  ;;  %v2798_v59 = vand.u32 4294901760, %v122_v41 }
  0x36   :  { %v2800_v60 = vand.u32 4294901760, %v137_v51  ;;  %v2802_v49 = vand.u32 4294901760, %v121_v36  ;;  %2084 = vmatprep.subr.mxu1 %v459_v45  ;;  %v2805_v61 = vsub.f32 %v139_v7, %v2792_v55  ;;  %v2808_v50 = vsub.f32 %v123_v48, %v2794_v56  ;;  %2052 = vmatprep.subr.mxu0 %v2792_v55 }
  0x37   :  { %v2811_v8 = vsub.f32 %v138_v47, %v2796_v57  ;;  %v2813_v53 = vand.u32 4294901760, %v136_v31  ;;  %2085 = vmatpush3.msra.mxu1 %v347_v52  ;;  %v2817_v32 = vsub.f32 %v122_v41, %v2798_v59  ;;  %v2825_v7 = vand.u32 4294901760, %v120_v30  ;;  %2053 = vmatpush3.msra.mxu0 %v2794_v56 }
  0x38   :  { %3990 = vst [vmem:[#allocation15_spill] sm:$0xff] %v2800_v60  ;;  %3991 = vst [vmem:[#allocation16_spill] sm:$0xff] %v2805_v61  ;;  %v2820_v46 = vsub.f32 %v137_v51, %v2800_v60  ;;  %v2823_v45 = vsub.f32 %v121_v36, %v2802_v49  ;;  %2086 = vmatprep.subr.mxu1 %v466_v35  ;;  %v3854_v47 = vand.u32 4294901760, %v2805_v61  ;;  %v3857_v48 = vand.u32 4294901760, %v2808_v50 }
  0x39   :  { %3992 = vst [vmem:[#allocation17_spill] sm:$0xff] %v2808_v50  ;;  %3993 = vst [vmem:[#allocation18_spill] sm:$0xff] %v2811_v8  ;;  %v3860_v52 = vand.u32 4294901760, %v2811_v8  ;;  %v2832_v41 = vsub.f32 %v136_v31, %v2813_v53  ;;  %2054 = vmatprep.subr.mxu0 %v2796_v57  ;;  %2087 = vmatpush3.msra.mxu1 %v354_v34  ;;  %v3865_v36 = vand.u32 4294901760, %v2817_v32 }
  0x3a   :  { %3994 = vst [vmem:[#allocation19_spill] sm:$0xff] %v2817_v32  ;;  %3995 = vst [vmem:[#allocation20_spill] sm:$0xff] %v2820_v46  ;;  %v2839_v35 = vsub.f32 %v120_v30, %v2825_v7  ;;  %2055 = vmatpush3.msra.mxu0 %v2798_v59  ;;  %2088 = vmatprep.subr.mxu1 %v473_v54  ;;  %v479_v31 = vsub.f32 %v2805_v61, %v3854_v47  ;;  %v3999_v54 = vand.u32 4294901760, %v2820_v46 }
  0x3b   :  { %3996 = vst [vmem:[#allocation21_spill] sm:$0xff] %v2823_v45  ;;  %3997 = vst [vmem:[#allocation22_spill] sm:$0xff] %v2832_v41  ;;  %v367_v34 = vsub.f32 %v2808_v50, %v3857_v48  ;;  %v486_v51 = vsub.f32 %v2811_v8, %v3860_v52  ;;  %2056 = vmatprep.subr.mxu0 %v2800_v60  ;;  %2089 = vmatpush3.msra.mxu1 %v361_v58  ;;  %v4000_v61 = vand.u32 4294901760, %v2823_v45 }
  0x3c   :  { %3998 = vst [vmem:[#allocation23_spill] sm:$0xff] %v2839_v35  ;;  %v374_v30 = vsub.f32 %v2817_v32, %v3865_v36  ;;  %v493_v47 = vsub.f32 %v2820_v46, %v3999_v54  ;;  %v3870_v50 = vand.u32 4294901760, %v2839_v35  ;;  %2057 = vmatpush3.msra.mxu0 %v2802_v49  ;;  %v480_v52 = vand.u32 4294901760, %v479_v31 }
  0x3d   :  { %v381_v48 = vsub.f32 %v2823_v45, %v4000_v61  ;;  %v368_v43 = vand.u32 4294901760, %v367_v34  ;;  %v487_v8 = vand.u32 4294901760, %v486_v51  ;;  %v4001_v58 = vand.u32 4294901760, %v2832_v41  ;;  %2058 = vmatprep.subr.mxu0 %v2813_v53  ;;  %v135_v34 = vld [vmem:[#allocation5 + $0x98] sm:$0xff] }
  0x3e   :  { %v375_v36 = vand.u32 4294901760, %v374_v30  ;;  %v388_v54 = vsub.f32 %v2839_v35, %v3870_v50  ;;  %2059 = vmatpush3.msra.mxu0 %v2825_v7  ;;  %2090 = vmatprep.subr.mxu1 %v480_v52  ;;  %v494_v61 = vand.u32 4294901760, %v493_v47  ;;  %v2872_v30 = vand.u32 4294901760, %v135_v34  ;;  %v134_v50 = vld [vmem:[#allocation5 + $0x90] sm:$0xff]  ;;  %v133_v47 = vld [vmem:[#allocation5 + $0x88] sm:$0xff] }
  0x3f   :  { %v500_v60 = vsub.f32 %v2832_v41, %v4001_v58  ;;  %2091 = vmatpush3.msra.mxu1 %v368_v43  ;;  %v382_v45 = vand.u32 4294901760, %v381_v48  ;;  %v119_v58 = vld [vmem:[#allocation5 + $0x18] sm:$0xff]  ;;  %v2879_v43 = vand.u32 4294901760, %v134_v50 }
  0x40   :  { %2092 = vmatprep.subr.mxu1 %v487_v8  ;;  %v389_v51 = vand.u32 4294901760, %v388_v54  ;;  %4002 = vst [vmem:[#allocation24_spill] sm:$0xff] %v2872_v30  ;;  %v2874_v41 = vand.u32 4294901760, %v119_v58  ;;  %v2877_v52 = vsub.f32 %v135_v34, %v2872_v30  ;;  %v118_v8 = vld [vmem:[#allocation5 + $0x10] sm:$0xff]  ;;  %2060 = vmatprep.subr.mxu0 %v2872_v30  ;;  %v2892_v54 = vand.u32 4294901760, %v133_v47 }
  0x41   :  { %v501_v31 = vand.u32 4294901760, %v500_v60  ;;  %2093 = vmatpush3.msra.mxu1 %v375_v36  ;;  %4005 = vst [vmem:[#allocation27_spill] sm:$0xff] %v2879_v43  ;;  %v2890_v36 = vsub.f32 %v134_v50, %v2879_v43 }
  0x42   :  { %2094 = vmatprep.subr.mxu1 %v494_v61  ;;  %4003 = vst [vmem:[#allocation25_spill] sm:$0xff] %v2874_v41  ;;  %4004 = vst [vmem:[#allocation26_spill] sm:$0xff] %v2877_v52  ;;  %v2883_v60 = vsub.f32 %v119_v58, %v2874_v41  ;;  %2061 = vmatpush3.msra.mxu0 %v2874_v41  ;;  %v3883_v48 = vand.u32 4294901760, %v2877_v52  ;;  %v117_v61 = vld [vmem:[#allocation5 + $0x8] sm:$0xff]  ;;  %v132_v58 = vld [vmem:[#allocation5 + $0x80] sm:$0xff]  ;;  %v2907_v46 = vsub.f32 %v133_v47, %v2892_v54 }
  0x43   :  { %2095 = vmatpush3.msra.mxu1 %v382_v45  ;;  %v2885_v45 = vand.u32 4294901760, %v118_v8  ;;  %4008 = vst [vmem:[#allocation30_spill] sm:$0xff] %v2890_v36  ;;  %4009 = vst [vmem:[#allocation31_spill] sm:$0xff] %v2892_v54  ;;  %2062 = vmatprep.subr.mxu0 %v2879_v43  ;;  %v2899_v34 = vand.u32 4294901760, %v117_v61  ;;  %v3894_v35 = vand.u32 4294901760, %v2890_v36  ;;  %v2909_v32 = vand.u32 4294901760, %v132_v58 }
  0x44   :  { %2096 = vmatprep.subr.mxu1 %v501_v31  ;;  %4006 = vst [vmem:[#allocation28_spill] sm:$0xff] %v2883_v60  ;;  %v507_v50 = vsub.f32 %v2877_v52, %v3883_v48  ;;  %4011 = vst [vmem:[#allocation33_spill] sm:$0xff] %v2907_v46  ;;  %v116_v31 = vld [vmem:[#allocation5] sm:$0xff] }
  0x45   :  { %2097 = vmatpush3.msra.mxu1 %v389_v51  ;;  %4007 = vst [vmem:[#allocation29_spill] sm:$0xff] %v2885_v45  ;;  %v2897_v51 = vsub.f32 %v118_v8, %v2885_v45  ;;  %4010 = vst [vmem:[#allocation32_spill] sm:$0xff] %v2899_v34  ;;  %2063 = vmatpush3.msra.mxu0 %v2885_v45  ;;  %v4012_v8 = vand.u32 4294901760, %v2883_v60  ;;  %v2917_v41 = vsub.f32 %v117_v61, %v2899_v34 }
  0x46   :  { %2064 = vmatprep.subr.mxu0 %v2892_v54  ;;  %v2919_v48 = vand.u32 4294901760, %v116_v31  ;;  %v508_v47 = vand.u32 4294901760, %v507_v50  ;;  %v514_v52 = vsub.f32 %v2890_v36, %v3894_v35  ;;  %v3897_v54 = vand.u32 4294901760, %v2907_v46 }
  0x47   :  { %v395_v43 = vsub.f32 %v2883_v60, %v4012_v8  ;;  %2065 = vmatpush3.msra.mxu0 %v2899_v34  ;;  %v2927_v30 = vsub.f32 %v132_v58, %v2909_v32  ;;  %v64_v8 = vlaneseq  ;;  %v4013_v61 = vand.u32 4294901760, %v2897_v51 }
  0x48   :  { %2066 = vmatprep.subr.mxu0 %v2909_v32  ;;  %v3901_v34 = vand.u32 4294901760, %v2917_v41  ;;  %2098 = vmatprep.subr.mxu1 %v508_v47  ;;  %v515_v50 = vand.u32 4294901760, %v514_v52  ;;  %v521_v35 = vsub.f32 %v2907_v46, %v3897_v54  ;;  %v2940_v36 = vsub.f32 %v116_v31, %v2919_v48 }
  0x49   :  { %v396_v45 = vand.u32 4294901760, %v395_v43  ;;  %v402_v60 = vsub.f32 %v2897_v51, %v4013_v61  ;;  %2067 = vmatpush3.msra.mxu0 %v2919_v48  ;;  %v3902_v58 = vand.u32 4294901760, %v2927_v30  ;;  %v2950_v46 = vand.u32 127, %v64_v8 }
  0x4a   :  { %4014 = vst [vmem:[#allocation34_spill] sm:$0xff] %v2940_v36  ;;  %2112 = vmatprep.subr.mxu0 %v2641_v22  ;;  %v409_v61 = vsub.f32 %v2917_v41, %v3901_v34  ;;  %v522_v47 = vand.u32 4294901760, %v521_v35  ;;  %v3903_v54 = vand.u32 4294901760, %v2940_v36 }
  0x4b   :  { %2099 = vmatpush3.msra.mxu1 %v396_v45  ;;  %v403_v43 = vand.u32 4294901760, %v402_v60  ;;  %v528_v52 = vsub.f32 %v2927_v30, %v3902_v58  ;;  %vm66_vm0 = vcmp.lt.s32.totalorder %v2950_v46, 127  ;;  %vm99_vm1 = vcmp.lt.s32.totalorder %v2950_v46, 120 }
  0x4c   :  { %2100 = vmatprep.subr.mxu1 %v515_v50  ;;  %v410_v31 = vand.u32 4294901760, %v409_v61  ;;  %v416_v60 = vsub.f32 %v2940_v36, %v3903_v54 }
  0x4d   :  { %2101 = vmatpush3.msra.mxu1 %v403_v43  ;;  %v529_v22 = vand.u32 4294901760, %v528_v52 }
  0x4e   :  { %2102 = vmatprep.subr.mxu1 %v522_v47  ;;  %v417_v35 = vand.u32 4294901760, %v416_v60 }
  0x4f   :  { %2103 = vmatpush3.msra.mxu1 %v410_v31 }
  0x50   :  { %2104 = vmatprep.subr.mxu1 %v529_v22 }
  0x51   :  { %2105 = vmatpush3.msra.mxu1 %v417_v35 }
  0x52   :  { %2150 = vmatprep.subr.mxu1 %v2620_v9 }
  0x90   :  { %v61_v45 = vpop.permute.xlu1 %60  ;;  %v53_v34 = vpop.permute.xlu0 %52 }
  0x94   :  { %v57_v50 = vpop.permute.xlu0 %56  ;;  %v49_v58 = vpop.permute.xlu1 %48 }
  0x95   :  { %v67_v8 = vsel %vm66_vm0, %v57_v50, %v61_v45  ;;  %v69_v43 = vsel %vm66_vm0, %v53_v34, %v57_v50  ;;  %v71_v22 = vsel %vm66_vm0, %v49_v58, %v53_v34 }
  0x96   :  { %v76_v61 = vmax.f32 %v2602_v1, %v69_v43  ;;  %v2963_v47 = vmax.f32 %v2608_v2, %v67_v8  ;;  %v75_v35 = vmax.f32 %v2610_v3, %v71_v22 }
  0x98   :  { %4015 = vst [vmem:[#allocation35_spill] sm:$0xff] %v2963_v47  ;;  %87 = vrot.lane.b32.xlu0 %v76_v61, %s2574_s1  ;;  %v55_v52 = vpop.permute.xlu0 %54  ;;  %91 = vrot.lane.b32.xlu1 %v2963_v47, %s2574_s1  ;;  %v59_v31 = vpop.permute.xlu1 %58 }
  0x99   :  { %v70_v60 = vsel %vm66_vm0, %v55_v52, %v59_v31 }
  0x9a   :  { %v80_v50 = vmax.f32 %v2616_v4, %v70_v60  ;;  %v73_v4 = vsel %vm66_vm0, %v61_v45, %v49_v58 }
  0x9c   :  { %v63_v1 = vpop.permute.xlu0 %62  ;;  %83 = vrot.lane.b32.xlu0 %v75_v35, %s2574_s1  ;;  %89 = vrot.lane.b32.xlu1 %v80_v50, %s2574_s1  ;;  %v51_v2 = vpop.permute.xlu1 %50 }
  0x9d   :  { %v68_v34 = vsel %vm66_vm0, %v59_v31, %v63_v1  ;;  %v72_v8 = vsel %vm66_vm0, %v51_v2, %v55_v52  ;;  %v74_v43 = vsel %vm66_vm0, %v63_v1, %v51_v2  ;;  %v2989_v31 = vmax.f32 %v2600_v0, %v73_v4 }
  0x9e   :  { %v2979_v54 = vmax.f32 %v2618_v5, %v68_v34  ;;  %v79_v3 = vmax.f32 %v2638_v21, %v72_v8  ;;  %v2985_v22 = vmax.f32 %v2636_v20, %v74_v43 }
  0x9f   :  { %4018 = vst [vmem:[#allocation38_spill] sm:$0xff] %v2989_v31 }
  0xa0   :  { %4016 = vst [vmem:[#allocation36_spill] sm:$0xff] %v2979_v54  ;;  %4017 = vst [vmem:[#allocation37_spill] sm:$0xff] %v2985_v22  ;;  %93 = vrot.lane.b32.xlu0 %v2979_v54, %s2574_s1  ;;  %85 = vrot.lane.b32.xlu1 %v79_v3, %s2574_s1 }
  0xa4   :  { %95 = vrot.lane.b32.xlu0 %v2989_v31, %s2574_s1  ;;  %97 = vrot.lane.b32.xlu1 %v2985_v22, %s2574_s1 }
 0x10a   :  { %v88_v5 = vpop.permute.xlu0 %87  ;;  %v92_v21 = vpop.permute.xlu1 %91 }
 0x10b   :  { %v102_v58 = vsel %vm99_vm1, %v88_v5, %v92_v21 }
 0x10c   :  { %v109_v45 = vmax.f32 %v76_v61, %v102_v58 }
 0x10e   :  { %v2996_v20 = vand.u32 4294901760, %v109_v45  ;;  %v84_v52 = vpop.permute.xlu0 %83  ;;  %v90_v60 = vpop.permute.xlu1 %89 }
 0x10f   :  { %v104_v0 = vsel %vm99_vm1, %v84_v52, %v88_v5 }
 0x110   :  { %v277_v1 = vsub.f32 %v109_v45, %v2996_v20  ;;  %v108_v2 = vmax.f32 %v75_v35, %v104_v0  ;;  %532 = vmatprep.mubr.f32.mxu1 %v2996_v20 }
 0x112   :  { %v3002_v34 = vand.u32 4294901760, %v108_v2  ;;  %v94_v8 = vpop.permute.xlu0 %93  ;;  %v86_v43 = vpop.permute.xlu1 %85  ;;  %v278_v4 = vand.u32 4294901760, %v277_v1 }
 0x113   :  { %v103_v61 = vsel %vm99_vm1, %v90_v60, %v94_v8  ;;  %v105_v58 = vsel %vm99_vm1, %v86_v43, %v90_v60 }
 0x114   :  { %4019 = vst [vmem:[#allocation39_spill] sm:$0xff] %v3002_v34  ;;  %v3009_v54 = vsub.f32 %v108_v2, %v3002_v34  ;;  %v113_v5 = vmax.f32 %v80_v50, %v103_v61  ;;  %v112_v22 = vmax.f32 %v79_v3, %v105_v58  ;;  %534 = vmatmul.mubr.f32.vlgmr.msra.gmra.mxu1 %v3002_v34  ;;  %v4043_v34 = vld [vmem:[#allocation26_spill] sm:$0xff] }
 0x115   :  { %v279_v35 = vsub.f32 %v277_v1, %v278_v4  ;;  %2151 = vmatpush3.msra.mxu1 %v2622_v10 }
 0x116   :  { %v3013_v45 = vand.u32 4294901760, %v113_v5  ;;  %v3015_v0 = vand.u32 4294901760, %v112_v22  ;;  %2152 = vmatprep.subr.mxu1 %v2624_v11  ;;  %v96_v47 = vpop.permute.xlu0 %95  ;;  %v98_v31 = vpop.permute.xlu1 %97  ;;  %v3912_v60 = vand.u32 4294901760, %v3009_v54 }
 0x117   :  { %v280_v36 = vand.u32 4294901760, %v279_v35  ;;  %v3021_v50 = vsel %vm99_vm1, %v92_v21, %v96_v47  ;;  %v3025_v3 = vsel %vm99_vm1, %v96_v47, %v84_v52  ;;  %2153 = vmatpush3.msra.mxu1 %v2630_v15  ;;  %v3030_v2 = vsel %vm99_vm1, %v94_v8, %v98_v31  ;;  %v4028_v35 = vld [vmem:[#allocation14_spill] sm:$0xff] }
 0x118   :  { %4020 = vst [vmem:[#allocation40_spill] sm:$0xff] %v3013_v45  ;;  %4021 = vst [vmem:[#allocation41_spill] sm:$0xff] %v3015_v0  ;;  %v3034_v61 = vsel %vm99_vm1, %v98_v31, %v86_v43  ;;  %v3037_v58 = vsub.f32 %v113_v5, %v3013_v45  ;;  %v3040_v21 = vsub.f32 %v112_v22, %v3015_v0  ;;  %2154 = vmatprep.subr.mxu1 %v2632_v16  ;;  %v4027_v5 = vld [vmem:[#allocation13_spill] sm:$0xff] }
 0x119   :  { %4022 = vst [vmem:[#allocation42_spill] sm:$0xff] %v3021_v50  ;;  %4023 = vst [vmem:[#allocation43_spill] sm:$0xff] %v3030_v2  ;;  %281 = vmatprep.mubr.f32.mxu0 %v280_v36  ;;  %539 = vmatprep.mubr.f32.mxu1 %v3013_v45  ;;  %v285_v47 = vsub.f32 %v3009_v54, %v3912_v60  ;;  %v4037_v60 = vld [vmem:[#allocation20_spill] sm:$0xff]  ;;  %v4038_v2 = vld [vmem:[#allocation31_spill] sm:$0xff] }
 0x11a   :  { %4024 = vst [vmem:[#allocation44_spill] sm:$0xff] %v3034_v61  ;;  %2155 = vmatpush3.msra.mxu1 %v2634_v17  ;;  %v3911_v46 = vand.u32 4294901760, %v3037_v58  ;;  %v3910_v31 = vand.u32 4294901760, %v3040_v21  ;;  %v4039_v61 = vld [vmem:[#allocation21_spill] sm:$0xff]  ;;  %v4040_v50 = vld [vmem:[#allocation32_spill] sm:$0xff]  ;;  %v4042_v45 = vld [vmem:[#allocation23_spill] sm:$0xff] }
 0x11b   :  { %541 = vmatmul.mubr.f32.gmra.mxu1 %v3015_v0  ;;  %2156 = vmatprep.subr.mxu1 %v2649_v25  ;;  %v286_v22 = vand.u32 4294901760, %v285_v47  ;;  %v4029_v47 = vld [vmem:[#allocation16_spill] sm:$0xff]  ;;  %v4041_v0 = vld [vmem:[#allocation22_spill] sm:$0xff] }
 0x11c   :  { %2157 = vmatpush3.msra.mxu1 %v2661_v29  ;;  %792 = vmatprep.mubr.f32.mxu1 %v278_v4  ;;  %v294_v36 = vsub.f32 %v3037_v58, %v3911_v46  ;;  %v300_v52 = vsub.f32 %v3040_v21, %v3910_v31  ;;  %v4026_v4 = vld [vmem:[#allocation12_spill] sm:$0xff]  ;;  %v4035_v31 = vld [vmem:[#allocation19_spill] sm:$0xff]  ;;  %v4036_v46 = vld [vmem:[#allocation29_spill] sm:$0xff] }
 0x11d   :  { %2158 = vmatprep.subr.mxu1 %v2711_v62  ;;  %287 = vmatmul.mubr.f32.vlgmr.msra.gmra.mxu0 %v286_v22  ;;  %v4030_v22 = vld [vmem:[#allocation24_spill] sm:$0xff] }
 0x11e   :  { %2113 = vmatpush3.msra.mxu0 %v2644_v23  ;;  %2159 = vmatpush3.msra.mxu1 %v2713_v63  ;;  %v295_v8 = vand.u32 4294901760, %v294_v36  ;;  %v301_v43 = vand.u32 4294901760, %v300_v52  ;;  %v4031_v36 = vld [vmem:[#allocation17_spill] sm:$0xff] }
 0x11f   :  { %2114 = vmatprep.subr.mxu0 %v2647_v24  ;;  %2160 = vmatprep.subr.mxu1 %v2715_v6  ;;  %v4032_v52 = vld [vmem:[#allocation25_spill] sm:$0xff] }
 0x120   :  { %2115 = vmatpush3.msra.mxu0 %v2653_v26  ;;  %2161 = vmatpush3.msra.mxu1 %v2718_v12 }
 0x121   :  { %2116 = vmatprep.subr.mxu0 %v2656_v27  ;;  %2162 = vmatprep.subr.mxu1 %v2720_v13 }
 0x122   :  { %296 = vmatprep.mubr.f32.mxu0 %v295_v8  ;;  %2117 = vmatpush3.msra.mxu0 %v2659_v28  ;;  %v4033_v8 = vld [vmem:[#allocation18_spill] sm:$0xff] }
 0x123   :  { %2163 = vmatpush3.msra.mxu1 %v2722_v14  ;;  %302 = vmatmul.mubr.f32.gmra.mxu0 %v301_v43  ;;  %v4034_v43 = vld [vmem:[#allocation27_spill] sm:$0xff] }
 0x124   :  { %2118 = vmatprep.subr.mxu0 %v2668_v33  ;;  %2164 = vmatprep.subr.mxu1 %v2733_v39 }
 0x125   :  { %2119 = vmatpush3.msra.mxu0 %v2679_v37  ;;  %676 = vmatprep.mubr.f32.mxu0 %v277_v1  ;;  %v4025_v1 = vld [vmem:[#allocation15_spill] sm:$0xff] }
 0x126   :  { %2165 = vmatpush3.msra.mxu1 %v2745_v44  ;;  %2120 = vmatprep.subr.mxu0 %v2725_v18 }
 0x127   :  { %2166 = vmatprep.subr.mxu1 %v2792_v55  ;;  %2121 = vmatpush3.msra.mxu0 %v2728_v19 }
 0x128   :  { %2167 = vmatpush3.msra.mxu1 %v2794_v56  ;;  %2122 = vmatprep.subr.mxu0 %v2731_v38 }
 0x129   :  { %2168 = vmatprep.subr.mxu1 %v2796_v57  ;;  %2123 = vmatpush3.msra.mxu0 %v2737_v40 }
 0x12a   :  { %2169 = vmatpush3.msra.mxu1 %v2798_v59  ;;  %2124 = vmatprep.subr.mxu0 %v2740_v42 }
 0x12b   :  { %2170 = vmatprep.subr.mxu1 %v4025_v1  ;;  %2125 = vmatpush3.msra.mxu0 %v4026_v4 }
 0x12c   :  { %2171 = vmatpush3.msra.mxu1 %v2802_v49  ;;  %2126 = vmatprep.subr.mxu0 %v4027_v5 }
 0x12d   :  { %2172 = vmatprep.subr.mxu1 %v2813_v53  ;;  %2127 = vmatpush3.msra.mxu0 %v4028_v35 }
 0x12e   :  { %2173 = vmatpush3.msra.mxu1 %v2825_v7  ;;  %2128 = vmatprep.subr.mxu0 %v4029_v47 }
 0x12f   :  { %2174 = vmatprep.subr.mxu1 %v4030_v22  ;;  %2129 = vmatpush3.msra.mxu0 %v4031_v36 }
 0x130   :  { %2175 = vmatpush3.msra.mxu1 %v4032_v52  ;;  %2130 = vmatprep.subr.mxu0 %v4033_v8 }
 0x131   :  { %2176 = vmatprep.subr.mxu1 %v4034_v43  ;;  %2131 = vmatpush3.msra.mxu0 %v4035_v31 }
 0x132   :  { %2177 = vmatpush3.msra.mxu1 %v4036_v46  ;;  %2132 = vmatprep.subr.mxu0 %v4037_v60  ;;  %v4044_v46 = vand.u32 4294901760, %v3009_v54 }
 0x133   :  { %2178 = vmatprep.subr.mxu1 %v4038_v2  ;;  %2133 = vmatpush3.msra.mxu0 %v4039_v61  ;;  %v4045_v2 = vld [vmem:[#allocation28_spill] sm:$0xff]  ;;  %v4046_v61 = vand.u32 4294901760, %v3037_v58 }
 0x134   :  { %2179 = vmatpush3.msra.mxu1 %v4040_v50  ;;  %2134 = vmatprep.subr.mxu0 %v4041_v0  ;;  %v4047_v0 = vld [vmem:[#allocation30_spill] sm:$0xff] }
 0x135   :  { %2180 = vmatprep.subr.mxu1 %v2909_v32  ;;  %2135 = vmatpush3.msra.mxu0 %v4042_v45 }
 0x136   :  { %2181 = vmatpush3.msra.mxu1 %v2919_v48  ;;  %2136 = vmatprep.subr.mxu0 %v4043_v34  ;;  %v4048_v34 = vld [vmem:[#allocation33_spill] sm:$0xff] }
 0x137   :  { %796 = vmatmul.mubr.f32.vlgmr.msra.gmra.mxu1 %v4044_v46  ;;  %2226 = vmatprep.subr.mxu1 %v2620_v9  ;;  %v4049_v46 = vand.u32 4294901760, %v3040_v21  ;;  %v4050_v9 = vld [vmem:[#allocation34_spill] sm:$0xff] }
 0x138   :  { %2137 = vmatpush3.msra.mxu0 %v4045_v2  ;;  %803 = vmatprep.mubr.f32.mxu1 %v4046_v61  ;;  %v4054_v61 = vand.u32 4294901760, %v2647_v24 }
 0x139   :  { %2227 = vmatpush3.msra.mxu1 %v2622_v10  ;;  %2138 = vmatprep.subr.mxu0 %v4047_v0  ;;  %v179_v10 = vld [vmem:[#allocation5 + $0x1f8] sm:$0xff] }
 0x13a   :  { %2228 = vmatprep.subr.mxu1 %v2624_v11  ;;  %2139 = vmatpush3.msra.mxu0 %v2897_v51  ;;  %v4051_v11 = vld [vmem:[#allocation11_spill] sm:$0xff] }
 0x13b   :  { %2229 = vmatpush3.msra.mxu1 %v2630_v15  ;;  %2140 = vmatprep.subr.mxu0 %v4048_v34  ;;  %v4052_v15 = vand.u32 4294901760, %v4051_v11 }
 0x13c   :  { %807 = vmatmul.mubr.f32.gmra.mxu1 %v4049_v46  ;;  %2230 = vmatprep.subr.mxu1 %v2632_v16  ;;  %v4053_v16 = vand.u32 4294901760, %v2644_v23  ;;  %v4060_v46 = vand.u32 4294901760, %v2725_v18  ;;  %v4063_v18 = vand.u32 4294901760, %v2731_v38  ;;  %v4066_v38 = vand.u32 4294901760, %v2740_v42 }
 0x13d   :  { %2141 = vmatpush3.msra.mxu0 %v2917_v41  ;;  %2231 = vmatpush3.msra.mxu1 %v2634_v17  ;;  %v3136_v17 = vand.u32 4294901760, %v179_v10 }
 0x13e   :  { %1084 = vmatprep.mubr.f32.mxu1 %v2996_v20  ;;  %2142 = vmatprep.subr.mxu0 %v2927_v30 }
 0x13f   :  { %2232 = vmatprep.subr.mxu1 %v2649_v25  ;;  %2143 = vmatpush3.msra.mxu0 %v4050_v9  ;;  %v163_v25 = vld [vmem:[#allocation5 + $0x178] sm:$0xff]  ;;  %v3152_v24 = vsub.f32 %v179_v10, %v3136_v17  ;;  %v160_v10 = vld [vmem:[#allocation5 + $0x160] sm:$0xff] }
 0x140   :  { %2233 = vmatpush3.msra.mxu1 %v2661_v29  ;;  %679 = vmatmul.mubr.f32.vlgmr.msra.gmra.mxu0 %v3009_v54  ;;  %v4055_v29 = vand.u32 4294901760, %v2653_v26  ;;  %v178_v54 = vld [vmem:[#allocation5 + $0x1f0] sm:$0xff]  ;;  %v3146_v23 = vand.u32 4294901760, %v163_v25 }
 0x141   :  { %2188 = vmatprep.subr.mxu0 %v4052_v15  ;;  %2234 = vmatprep.subr.mxu1 %v2711_v62  ;;  %v162_v62 = vld [vmem:[#allocation5 + $0x170] sm:$0xff]  ;;  %v3157_v26 = vand.u32 4294901760, %v178_v54  ;;  %v175_v15 = vld [vmem:[#allocation5 + $0x1d8] sm:$0xff] }
 0x142   :  { %685 = vmatprep.mubr.f32.mxu0 %v3037_v58  ;;  %2189 = vmatpush3.msra.mxu0 %v4053_v16  ;;  %v4056_v58 = vand.u32 4294901760, %v2656_v27  ;;  %v3162_v27 = vand.u32 4294901760, %v162_v62 }
 0x143   :  { %2235 = vmatpush3.msra.mxu1 %v2713_v63  ;;  %2190 = vmatprep.subr.mxu0 %v4054_v61  ;;  %v4057_v63 = vand.u32 4294901760, %v2659_v28  ;;  %v3168_v28 = vsub.f32 %v163_v25, %v3146_v23  ;;  %v3196_v61 = vand.u32 4294901760, %v160_v10 }
 0x144   :  { %2236 = vmatprep.subr.mxu1 %v2715_v6  ;;  %2191 = vmatpush3.msra.mxu0 %v4055_v29  ;;  %v177_v6 = vld [vmem:[#allocation5 + $0x1e8] sm:$0xff]  ;;  %v174_v29 = vld [vmem:[#allocation5 + $0x1d0] sm:$0xff] }
 0x145   :  { %2237 = vmatpush3.msra.mxu1 %v2718_v12  ;;  %688 = vmatmul.mubr.f32.gmra.mxu0 %v3040_v21  ;;  %v4058_v12 = vand.u32 4294901760, %v2668_v33  ;;  %v161_v21 = vld [vmem:[#allocation5 + $0x168] sm:$0xff]  ;;  %v3925_v33 = vand.u32 4294901760, %v3152_v24  ;;  %v3922_v25 = vand.u32 4294901760, %v3168_v28 }
 0x146   :  { %2192 = vmatprep.subr.mxu0 %v4056_v58  ;;  %2238 = vmatprep.subr.mxu1 %v2720_v13  ;;  %v4059_v13 = vand.u32 4294901760, %v2679_v37  ;;  %v3180_v37 = vsub.f32 %v178_v54, %v3157_v26  ;;  %v3182_v11 = vand.u32 4294901760, %v161_v21  ;;  %v158_v54 = vld [vmem:[#allocation5 + $0x150] sm:$0xff] }
 0x147   :  { %2193 = vmatpush3.msra.mxu0 %v4057_v63  ;;  %973 = vmatprep.mubr.f32.mxu0 %v2996_v20  ;;  %v176_v20 = vld [vmem:[#allocation5 + $0x1e0] sm:$0xff]  ;;  %v173_v63 = vld [vmem:[#allocation5 + $0x1c8] sm:$0xff] }
 0x148   :  { %2239 = vmatpush3.msra.mxu1 %v2722_v14  ;;  %2194 = vmatprep.subr.mxu0 %v4058_v12  ;;  %v3174_v14 = vand.u32 4294901760, %v177_v6  ;;  %4062 = vst [vmem:[#allocation15_spill] sm:$0xff] %v3180_v37  ;;  %v3190_v16 = vand.u32 4294901760, %v176_v20  ;;  %v3216_v42 = vsub.f32 %v161_v21, %v3182_v11  ;;  %v4072_v21 = vand.u32 4294901760, %v4028_v35 }
 0x149   :  { %2240 = vmatprep.subr.mxu1 %v2733_v39  ;;  %2195 = vmatpush3.msra.mxu0 %v4059_v13  ;;  %v4061_v39 = vand.u32 4294901760, %v2728_v19  ;;  %v4065_v19 = vand.u32 4294901760, %v2737_v40  ;;  %v3209_v40 = vand.u32 4294901760, %v175_v15  ;;  %v157_v13 = vld [vmem:[#allocation5 + $0x148] sm:$0xff] }
 0x14a   :  { %2241 = vmatpush3.msra.mxu1 %v2745_v44  ;;  %2196 = vmatprep.subr.mxu0 %v4060_v46  ;;  %v3188_v44 = vsub.f32 %v162_v62, %v3162_v27  ;;  %v4068_v62 = vand.u32 4294901760, %v4026_v4  ;;  %4069 = vst [vmem:[#allocation14_spill] sm:$0xff] %v3216_v42  ;;  %v3227_v4 = vand.u32 4294901760, %v174_v29  ;;  %v3240_v46 = vand.u32 4294901760, %v158_v54 }
 0x14b   :  { %2242 = vmatprep.subr.mxu1 %v2792_v55  ;;  %2197 = vmatpush3.msra.mxu0 %v4061_v39  ;;  %v159_v55 = vld [vmem:[#allocation5 + $0x158] sm:$0xff]  ;;  %v4074_v39 = vand.u32 4294901760, %v4029_v47  ;;  %v3923_v47 = vand.u32 4294901760, %v3216_v42 }
 0x14c   :  { %2243 = vmatpush3.msra.mxu1 %v2794_v56  ;;  %2198 = vmatprep.subr.mxu0 %v4063_v18  ;;  %4064 = vst [vmem:[#allocation12_spill] sm:$0xff] %v3188_v44  ;;  %v3204_v56 = vsub.f32 %v3152_v24, %v3925_v33  ;;  %v3218_v58 = vand.u32 4294901760, %v159_v55  ;;  %v3919_v12 = vand.u32 4294901760, %v3188_v44  ;;  %v3248_v18 = vsub.f32 %v175_v15, %v3209_v40  ;;  %v156_v15 = vld [vmem:[#allocation5 + $0x140] sm:$0xff] }
 0x14d   :  { %2244 = vmatprep.subr.mxu1 %v2796_v57  ;;  %2199 = vmatpush3.msra.mxu0 %v4065_v19  ;;  %v3207_v57 = vsub.f32 %v177_v6, %v3174_v14  ;;  %v4070_v6 = vand.u32 4294901760, %v4027_v5  ;;  %v3238_v5 = vsub.f32 %v160_v10, %v3196_v61  ;;  %v3250_v19 = vand.u32 4294901760, %v173_v63 }
 0x14e   :  { %2245 = vmatpush3.msra.mxu1 %v2798_v59  ;;  %2200 = vmatprep.subr.mxu0 %v4066_v38  ;;  %v3921_v59 = vand.u32 4294901760, %v3180_v37  ;;  %4075 = vst [vmem:[#allocation17_spill] sm:$0xff] %v3248_v18  ;;  %v4076_v10 = vand.u32 4294901760, %v4031_v36  ;;  %v3262_v38 = vsub.f32 %v159_v55, %v3218_v58  ;;  %v3272_v36 = vsub.f32 %v3188_v44, %v3919_v12  ;;  %v4083_v12 = vld [vmem:[#allocation29_spill] sm:$0xff] }
 0x14f   :  { %4067 = vst [vmem:[#allocation13_spill] sm:$0xff] %v3207_v57  ;;  %2246 = vmatprep.subr.mxu1 %v4025_v1  ;;  %2201 = vmatpush3.msra.mxu0 %v4068_v62  ;;  %v3225_v1 = vsub.f32 %v176_v20, %v3190_v16  ;;  %4073 = vst [vmem:[#allocation24_spill] sm:$0xff] %v3238_v5  ;;  %v172_v20 = vld [vmem:[#allocation5 + $0x1c0] sm:$0xff]  ;;  %v3920_v35 = vand.u32 4294901760, %v3207_v57 }
 0x150   :  { %2247 = vmatpush3.msra.mxu1 %v2802_v49  ;;  %2202 = vmatprep.subr.mxu0 %v4070_v6  ;;  %v3235_v49 = vsub.f32 %v3168_v28, %v3922_v25  ;;  %4077 = vst [vmem:[#allocation25_spill] sm:$0xff] %v3262_v38  ;;  %v3276_v6 = vsub.f32 %v174_v29, %v3227_v4  ;;  %v3278_v55 = vand.u32 4294901760, %v172_v20  ;;  %v4084_v29 = vand.u32 4294901760, %v4037_v60 }
 0x151   :  { %4071 = vst [vmem:[#allocation16_spill] sm:$0xff] %v3225_v1  ;;  %2248 = vmatprep.subr.mxu1 %v2813_v53  ;;  %2203 = vmatpush3.msra.mxu0 %v4072_v21  ;;  %v1342_v53 = vand.u32 4294901760, %v3204_v56  ;;  %v3264_v56 = vand.u32 4294901760, %v157_v13  ;;  %v3924_v62 = vand.u32 4294901760, %v3225_v1  ;;  %v4080_v21 = vld [vmem:[#allocation38_spill] sm:$0xff] }
 0x152   :  { %2249 = vmatpush3.msra.mxu1 %v2825_v7  ;;  %2204 = vmatprep.subr.mxu0 %v4074_v39  ;;  %v3258_v7 = vsub.f32 %v3180_v37, %v3921_v59  ;;  %4079 = vst [vmem:[#allocation18_spill] sm:$0xff] %v3276_v6  ;;  %v111_v39 = vmax.f32 %v4080_v21, %v3025_v3  ;;  %v171_v21 = vld [vmem:[#allocation5 + $0x1b8] sm:$0xff]  ;;  %v4090_v59 = vld [vmem:[#allocation22_spill] sm:$0xff] }
 0x153   :  { %2250 = vmatprep.subr.mxu1 %v4030_v22  ;;  %2205 = vmatpush3.msra.mxu0 %v4076_v10  ;;  %v4078_v22 = vand.u32 4294901760, %v4033_v8  ;;  %v1230_v8 = vand.u32 4294901760, %v3235_v49  ;;  %v3926_v10 = vand.u32 4294901760, %v3238_v5  ;;  %v3296_v3 = vsub.f32 %v3207_v57, %v3920_v35 }
 0x154   :  { %2251 = vmatpush3.msra.mxu1 %v4032_v52  ;;  %v4081_v52 = vand.u32 4294901760, %v4035_v31  ;;  %v3927_v31 = vand.u32 4294901760, %v3248_v18  ;;  %v3302_v49 = vand.u32 4294901760, %v156_v15  ;;  %v1349_v60 = vand.u32 4294901760, %v3258_v7 }
 0x155   :  { %2206 = vmatprep.subr.mxu0 %v4078_v22  ;;  %2252 = vmatprep.subr.mxu1 %v4034_v43  ;;  %v3288_v22 = vsub.f32 %v158_v54, %v3240_v46  ;;  %v3300_v43 = vsub.f32 %v173_v63, %v3250_v19  ;;  %v4086_v54 = vld [vmem:[#allocation31_spill] sm:$0xff]  ;;  %v3928_v35 = vand.u32 4294901760, %v3262_v38  ;;  %v3315_v63 = vsub.f32 %v157_v13, %v3264_v56 }
 0x156   :  { %2207 = vmatpush3.msra.mxu0 %v4081_v52  ;;  %2253 = vmatpush3.msra.mxu1 %v4083_v12  ;;  %v4087_v52 = vld [vmem:[#allocation21_spill] sm:$0xff]  ;;  %v4091_v25 = vand.u32 4294901760, %v4090_v59  ;;  %v3324_v7 = vsub.f32 %v3225_v1, %v3924_v62  ;;  %v3330_v13 = vand.u32 4294901760, %v111_v39  ;;  %v170_v62 = vld [vmem:[#allocation5 + $0x1b0] sm:$0xff] }
 0x157   :  { %4082 = vst [vmem:[#allocation27_spill] sm:$0xff] %v3288_v22  ;;  %2208 = vmatprep.subr.mxu0 %v4084_v29  ;;  %4085 = vst [vmem:[#allocation19_spill] sm:$0xff] %v3300_v43  ;;  %2254 = vmatprep.subr.mxu1 %v4086_v54  ;;  %v4088_v12 = vand.u32 4294901760, %v4087_v52  ;;  %v3311_v29 = vsub.f32 %v3216_v42, %v3923_v47  ;;  %v1237_v54 = vand.u32 4294901760, %v3272_v36  ;;  %v155_v47 = vld [vmem:[#allocation5 + $0x138] sm:$0xff]  ;;  %v3341_v36 = vand.u32 4294901760, %v171_v21 }
 0x158   :  { %4089 = vst [vmem:[#allocation20_spill] sm:$0xff] %v3315_v63  ;;  %2255 = vmatpush3.msra.mxu1 %v4040_v50  ;;  %4093 = vst [vmem:[#allocation23_spill] sm:$0xff] %v3330_v13  ;;  %v4094_v50 = vand.u32 4294901760, %v4042_v45  ;;  %v3350_v45 = vsub.f32 %v3248_v18, %v3927_v31  ;;  %v4098_v59 = vld [vmem:[#allocation39_spill] sm:$0xff]  ;;  %v1363_v52 = vand.u32 4294901760, %v3324_v7  ;;  %v3379_v18 = vsub.f32 %v111_v39, %v3330_v13 }
 0x159   :  { %2209 = vmatpush3.msra.mxu0 %v4088_v12  ;;  %v3328_v12 = vsub.f32 %v172_v20, %v3278_v55  ;;  %2256 = vmatprep.subr.mxu1 %v2909_v32  ;;  %v4095_v20 = vld [vmem:[#allocation26_spill] sm:$0xff]  ;;  %v1356_v32 = vand.u32 4294901760, %v3296_v3  ;;  %v154_v31 = vld [vmem:[#allocation5 + $0x130] sm:$0xff]  ;;  %v4103_v7 = vand.u32 4294901760, %v3288_v22 }
 0x15a   :  { %2210 = vmatprep.subr.mxu0 %v4091_v25  ;;  %v3338_v25 = vsub.f32 %v3238_v5, %v3926_v10  ;;  %2257 = vmatpush3.msra.mxu1 %v2919_v48  ;;  %v4096_v33 = vand.u32 4294901760, %v4095_v20  ;;  %v3354_v10 = vsub.f32 %v156_v15, %v3302_v49  ;;  %v1244_v48 = vand.u32 4294901760, %v3311_v29  ;;  %v4100_v15 = vld [vmem:[#allocation40_spill] sm:$0xff]  ;;  %v169_v3 = vld [vmem:[#allocation5 + $0x1a8] sm:$0xff] }
 0x15b   :  { %4092 = vst [vmem:[#allocation32_spill] sm:$0xff] %v3328_v12  ;;  %2211 = vmatpush3.msra.mxu0 %v4094_v50  ;;  %1086 = vmatmul.mubr.f32.vlgmr.msra.gmra.mxu1 %v4098_v59  ;;  %v3364_v20 = vand.u32 4294901760, %v155_v47  ;;  %v4099_v50 = vand.u32 4294901760, %v4045_v2  ;;  %v4102_v2 = vand.u32 4294901760, %v4047_v0  ;;  %v3387_v5 = vsub.f32 %v3288_v22, %v4103_v7  ;;  %v168_v7 = vld [vmem:[#allocation5 + $0x1a0] sm:$0xff] }
 0x15c   :  { %2212 = vmatprep.subr.mxu0 %v4096_v33  ;;  %4097 = vst [vmem:[#allocation28_spill] sm:$0xff] %v3354_v10  ;;  %2302 = vmatprep.subr.mxu1 %v1342_v53  ;;  %v3361_v33 = vsub.f32 %v3262_v38, %v3928_v35  ;;  %v4101_v53 = vand.u32 4294901760, %v3276_v6  ;;  %v3376_v38 = vand.u32 4294901760, %v170_v62  ;;  %v153_v35 = vld [vmem:[#allocation5 + $0x128] sm:$0xff]  ;;  %v1370_v39 = vand.u32 4294901760, %v3350_v45 }
 0x15d   :  { %2213 = vmatpush3.msra.mxu0 %v4099_v50  ;;  %1091 = vmatprep.mubr.f32.mxu1 %v4100_v15  ;;  %v1251_v50 = vand.u32 4294901760, %v3338_v25  ;;  %v4106_v0 = vand.u32 4294901760, %v3300_v43  ;;  %v3412_v45 = vsub.f32 %v155_v47, %v3364_v20  ;;  %v152_v25 = vld [vmem:[#allocation5 + $0x120] sm:$0xff]  ;;  %v167_v47 = vld [vmem:[#allocation5 + $0x198] sm:$0xff]  ;;  %v1265_v22 = vand.u32 4294901760, %v3387_v5 }
 0x15e   :  { %v3373_v29 = vsub.f32 %v3276_v6, %v4101_v53  ;;  %2303 = vmatpush3.msra.mxu1 %v1230_v8  ;;  %2214 = vmatprep.subr.mxu0 %v4102_v2  ;;  %v3390_v53 = vsub.f32 %v171_v21, %v3341_v36  ;;  %v4105_v6 = vand.u32 4294901760, %v2897_v51  ;;  %v3401_v2 = vand.u32 4294901760, %v154_v31 }
 0x15f   :  { %2304 = vmatprep.subr.mxu1 %v1349_v60  ;;  %v3398_v8 = vsub.f32 %v3300_v43, %v4106_v0  ;;  %v4107_v21 = vand.u32 4294901760, %v4048_v34  ;;  %v1258_v60 = vand.u32 4294901760, %v3361_v33  ;;  %v4108_v51 = vand.u32 4294901760, %v3315_v63  ;;  %4109 = vst [vmem:[#allocation33_spill] sm:$0xff] %v3412_v45  ;;  %v4110_v43 = vld [vmem:[#allocation41_spill] sm:$0xff] }
 0x160   :  { %4104 = vst [vmem:[#allocation30_spill] sm:$0xff] %v3390_v53  ;;  %2215 = vmatpush3.msra.mxu0 %v4105_v6  ;;  %2305 = vmatpush3.msra.mxu1 %v1237_v54  ;;  %v3414_v0 = vand.u32 4294901760, %v169_v3  ;;  %v1377_v54 = vand.u32 4294901760, %v3373_v29  ;;  %v4111_v34 = vand.u32 4294901760, %v3328_v12  ;;  %v3433_v1 = vand.u32 4294901760, %v168_v7  ;;  %v166_v29 = vld [vmem:[#allocation5 + $0x190] sm:$0xff] }
 0x161   :  { %2216 = vmatprep.subr.mxu0 %v4107_v21  ;;  %v3409_v6 = vsub.f32 %v3315_v63, %v4108_v51  ;;  %1093 = vmatmul.mubr.f32.gmra.mxu1 %v4110_v43  ;;  %v3424_v21 = vsub.f32 %v170_v62, %v3376_v38  ;;  %v3426_v51 = vand.u32 4294901760, %v153_v35  ;;  %v4113_v63 = vand.u32 4294901760, %v2917_v41 }
 0x162   :  { %2306 = vmatprep.subr.mxu1 %v1356_v32  ;;  %v3421_v33 = vsub.f32 %v3328_v12, %v4111_v34  ;;  %v151_v34 = vld [vmem:[#allocation5 + $0x118] sm:$0xff]  ;;  %1450 = vmatprep.mubr.f32.mxu1 %v3330_v13  ;;  %v4114_v62 = vand.u32 4294901760, %v2927_v30  ;;  %v1384_v12 = vand.u32 4294901760, %v3398_v8  ;;  %v4115_v41 = vand.u32 4294901760, %v3354_v10 }
 0x163   :  { %4112 = vst [vmem:[#allocation34_spill] sm:$0xff] %v3424_v21  ;;  %2217 = vmatpush3.msra.mxu0 %v4113_v63  ;;  %2307 = vmatpush3.msra.mxu1 %v1244_v48  ;;  %v3445_v5 = vsub.f32 %v154_v31, %v3401_v2  ;;  %v3447_v48 = vand.u32 4294901760, %v152_v25  ;;  %v4116_v32 = vand.u32 4294901760, %v4050_v9  ;;  %v1272_v30 = vand.u32 4294901760, %v3409_v6  ;;  %v165_v6 = vld [vmem:[#allocation5 + $0x188] sm:$0xff] }
 0x164   :  { %2218 = vmatprep.subr.mxu0 %v4114_v62  ;;  %v3442_v63 = vsub.f32 %v3354_v10, %v4115_v41  ;;  %2308 = vmatprep.subr.mxu1 %v1363_v52  ;;  %v3454_v8 = vsub.f32 %v169_v3, %v3414_v0  ;;  %v3456_v13 = vand.u32 4294901760, %v167_v47  ;;  %v150_v41 = vld [vmem:[#allocation5 + $0x110] sm:$0xff]  ;;  %v1391_v31 = vand.u32 4294901760, %v3421_v33  ;;  %v148_v10 = vld [vmem:[#allocation5 + $0x100] sm:$0xff] }
 0x165   :  { %2219 = vmatpush3.msra.mxu0 %v4116_v32  ;;  %2309 = vmatpush3.msra.mxu1 %v1251_v50  ;;  %v3462_v9 = vsub.f32 %v153_v35, %v3426_v51  ;;  %v3464_v32 = vand.u32 4294901760, %v151_v34  ;;  %v4118_v3 = vand.u32 4294901760, %v3379_v18  ;;  %v4119_v50 = vand.u32 4294901760, %v3390_v53  ;;  %v149_v35 = vld [vmem:[#allocation5 + $0x108] sm:$0xff] }
 0x166   :  { %975 = vmatmul.mubr.f32.vlgmr.msra.gmra.mxu0 %v4098_v59  ;;  %2264 = vmatprep.subr.mxu0 %v3136_v17  ;;  %v3474_v33 = vsub.f32 %v168_v7, %v3433_v1  ;;  %v3476_v52 = vand.u32 4294901760, %v166_v29  ;;  %v3485_v42 = vand.u32 4294901760, %v150_v41  ;;  %v4124_v7 = vand.u32 4294901760, %v3412_v45 }
 0x167   :  { %4117 = vst [vmem:[#allocation11_spill] sm:$0xff] %v3462_v9  ;;  %2310 = vmatprep.subr.mxu1 %v1370_v39  ;;  %v1197_v62 = vsub.f32 %v3379_v18, %v4118_v3  ;;  %v1397_v59 = vsub.f32 %v3390_v53, %v4119_v50  ;;  %980 = vmatprep.mubr.f32.mxu0 %v4100_v15  ;;  %v1279_v39 = vand.u32 4294901760, %v3442_v63  ;;  %v164_v50 = vld [vmem:[#allocation5 + $0x180] sm:$0xff]  ;;  %v3495_v63 = vand.u32 4294901760, %v165_v6 }
 0x168   :  { %4120 = vst [vmem:[#allocation38_spill] sm:$0xff] %v3474_v33  ;;  %4121 = vst [vmem:[#allocation29_spill] sm:$0xff] %v3476_v52  ;;  %2265 = vmatpush3.msra.mxu0 %v3146_v23  ;;  %v3483_v3 = vsub.f32 %v152_v25, %v3447_v48  ;;  %2311 = vmatpush3.msra.mxu1 %v1258_v60  ;;  %v1285_v53 = vsub.f32 %v3412_v45, %v4124_v7  ;;  %v4126_v25 = vand.u32 4294901760, %v3424_v21 }
 0x169   :  { %4123 = vst [vmem:[#allocation21_spill] sm:$0xff] %v3485_v42  ;;  %2266 = vmatprep.subr.mxu0 %v3157_v26  ;;  %v3493_v57 = vsub.f32 %v167_v47, %v3456_v13  ;;  %2312 = vmatprep.subr.mxu1 %v1377_v54  ;;  %v3503_v37 = vsub.f32 %v151_v34, %v3464_v32  ;;  %v3505_v7 = vand.u32 4294901760, %v149_v35  ;;  %v1198_v47 = vand.u32 4294901760, %v1197_v62 }
 0x16a   :  { %4122 = vst [vmem:[#allocation31_spill] sm:$0xff] %v3483_v3  ;;  %2267 = vmatpush3.msra.mxu0 %v3162_v27  ;;  %v1404_v60 = vsub.f32 %v3424_v21, %v4126_v25  ;;  %2313 = vmatpush3.msra.mxu1 %v1265_v22  ;;  %v3510_v54 = vsub.f32 %v166_v29, %v3476_v52  ;;  %v3512_v45 = vand.u32 4294901760, %v164_v50  ;;  %v4128_v25 = vand.u32 4294901760, %v3445_v5 }
 0x16b   :  { %4125 = vst [vmem:[#allocation22_spill] sm:$0xff] %v3493_v57  ;;  %982 = vmatmul.mubr.f32.gmra.mxu0 %v4110_v43  ;;  %2268 = vmatprep.subr.mxu0 %v3174_v14  ;;  %v3520_v22 = vsub.f32 %v150_v41, %v3485_v42  ;;  %v3522_v43 = vand.u32 4294901760, %v148_v10  ;;  %v1398_v29 = vand.u32 4294901760, %v1397_v59  ;;  %v4129_v62 = vand.u32 4294901760, %v3454_v8 }
 0x16c   :  { %4127 = vst [vmem:[#allocation26_spill] sm:$0xff] %v3510_v54  ;;  %2314 = vmatprep.subr.mxu1 %v1384_v12  ;;  %v1292_v34 = vsub.f32 %v3445_v5, %v4128_v25  ;;  %2269 = vmatpush3.msra.mxu0 %v3182_v11  ;;  %v3530_v21 = vsub.f32 %v165_v6, %v3495_v63  ;;  %v1286_v41 = vand.u32 4294901760, %v1285_v53  ;;  %v4130_v25 = vand.u32 4294901760, %v3462_v9 }
 0x16d   :  { %1199 = vmatprep.mubr.f32.mxu0 %v1198_v47  ;;  %v1411_v15 = vsub.f32 %v3454_v8, %v4129_v62  ;;  %2315 = vmatpush3.msra.mxu1 %v1272_v30  ;;  %v3538_v59 = vsub.f32 %v149_v35, %v3505_v7  ;;  %v1405_v62 = vand.u32 4294901760, %v1404_v60  ;;  %v4132_v6 = vand.u32 4294901760, %v3474_v33 }
 0x16e   :  { %2270 = vmatprep.subr.mxu0 %v3190_v16  ;;  %v1299_v44 = vsub.f32 %v3462_v9, %v4130_v25  ;;  %2316 = vmatprep.subr.mxu1 %v1391_v31  ;;  %v3546_v53 = vsub.f32 %v164_v50, %v3512_v45  ;;  %v1293_v25 = vand.u32 4294901760, %v1292_v34  ;;  %v4133_v35 = vand.u32 4294901760, %v3483_v3 }
 0x16f   :  { %4131 = vst [vmem:[#allocation39_spill] sm:$0xff] %v3538_v59  ;;  %2271 = vmatpush3.msra.mxu0 %v3196_v61  ;;  %v1418_v30 = vsub.f32 %v3474_v33, %v4132_v6  ;;  %2317 = vmatpush3.msra.mxu1 %v1279_v39  ;;  %v3554_v60 = vsub.f32 %v148_v10, %v3522_v43  ;;  %v1412_v6 = vand.u32 4294901760, %v1411_v15  ;;  %v4134_v50 = vand.u32 4294901760, %v3493_v57 }
 0x170   :  { %2272 = vmatprep.subr.mxu0 %v3209_v40  ;;  %v1306_v31 = vsub.f32 %v3483_v3, %v4133_v35  ;;  %2318 = vmatprep.subr.mxu1 %v1398_v29  ;;  %v1300_v34 = vand.u32 4294901760, %v1299_v44  ;;  %v4135_v35 = vand.u32 4294901760, %v3503_v37  ;;  %v4136_v29 = vand.u32 4294901760, %v3510_v54 }
 0x171   :  { %2273 = vmatpush3.msra.mxu0 %v3218_v58  ;;  %v1425_v39 = vsub.f32 %v3493_v57, %v4134_v50  ;;  %2319 = vmatpush3.msra.mxu1 %v1286_v41  ;;  %v1419_v15 = vand.u32 4294901760, %v1418_v30  ;;  %v4137_v41 = vld [vmem:[#allocation42_spill] sm:$0xff]  ;;  %v4138_v57 = vld [vmem:[#allocation35_spill] sm:$0xff] }
 0x172   :  { %2274 = vmatprep.subr.mxu0 %v3227_v4  ;;  %v1313_v47 = vsub.f32 %v3503_v37, %v4135_v35  ;;  %2320 = vmatprep.subr.mxu1 %v1405_v62  ;;  %v1432_v50 = vsub.f32 %v3510_v54, %v4136_v29  ;;  %v110_v3 = vmax.f32 %v4138_v57, %v4137_v41  ;;  %v1307_v44 = vand.u32 4294901760, %v1306_v31  ;;  %v4141_v54 = vld [vmem:[#allocation44_spill] sm:$0xff]  ;;  %v4142_v57 = vld [vmem:[#allocation37_spill] sm:$0xff] }
 0x173   :  { %2275 = vmatpush3.msra.mxu0 %v3240_v46  ;;  %2321 = vmatpush3.msra.mxu1 %v1293_v25  ;;  %v4139_v35 = vand.u32 4294901760, %v3520_v22  ;;  %v1426_v30 = vand.u32 4294901760, %v1425_v39  ;;  %v4140_v29 = vand.u32 4294901760, %v3530_v21  ;;  %v115_v25 = vmax.f32 %v4142_v57, %v4141_v54  ;;  %v4147_v57 = vld [vmem:[#allocation43_spill] sm:$0xff] }
 0x174   :  { %2276 = vmatprep.subr.mxu0 %v3250_v19  ;;  %2322 = vmatprep.subr.mxu1 %v1412_v6  ;;  %v1314_v31 = vand.u32 4294901760, %v1313_v47  ;;  %v4143_v41 = vand.u32 4294901760, %v3538_v59  ;;  %v1433_v6 = vand.u32 4294901760, %v1432_v50  ;;  %v4144_v39 = vand.u32 4294901760, %v3546_v53 }
 0x175   :  { %v1320_v62 = vsub.f32 %v3520_v22, %v4139_v35  ;;  %2277 = vmatpush3.msra.mxu0 %v3264_v56  ;;  %v1439_v12 = vsub.f32 %v3530_v21, %v4140_v29  ;;  %2323 = vmatpush3.msra.mxu1 %v1300_v34  ;;  %v3592_v29 = vand.u32 4294901760, %v110_v3  ;;  %v4146_v47 = vand.u32 4294901760, %v3554_v60 }
 0x176   :  { %2278 = vmatprep.subr.mxu0 %v3278_v55  ;;  %v1327_v35 = vsub.f32 %v3538_v59, %v4143_v41  ;;  %2324 = vmatprep.subr.mxu1 %v1419_v15  ;;  %v1446_v10 = vsub.f32 %v3546_v53, %v4144_v39  ;;  %v4148_v41 = vld [vmem:[#allocation36_spill] sm:$0xff]  ;;  %v3601_v59 = vand.u32 4294901760, %v115_v25 }
 0x177   :  { %2279 = vmatpush3.msra.mxu0 %v3302_v49  ;;  %4145 = vst [vmem:[#allocation40_spill] sm:$0xff] %v3592_v29  ;;  %2325 = vmatpush3.msra.mxu1 %v1307_v44  ;;  %v1321_v54 = vand.u32 4294901760, %v1320_v62  ;;  %v1334_v34 = vsub.f32 %v3554_v60, %v4146_v47  ;;  %v114_v15 = vmax.f32 %v4148_v41, %v4147_v57  ;;  %v1440_v50 = vand.u32 4294901760, %v1439_v12 }
 0x178   :  { %2280 = vmatprep.subr.mxu0 %v3341_v36  ;;  %2326 = vmatprep.subr.mxu1 %v1426_v30  ;;  %4149 = vst [vmem:[#allocation41_spill] sm:$0xff] %v3601_v59  ;;  %v1328_v44 = vand.u32 4294901760, %v1327_v35  ;;  %v1447_v62 = vand.u32 4294901760, %v1446_v10  ;;  %v3606_v39 = vsub.f32 %v110_v3, %v3592_v29  ;;  %v3613_v12 = vsub.f32 %v115_v25, %v3601_v59 }
 0x179   :  { %2281 = vmatpush3.msra.mxu0 %v3364_v20  ;;  %2327 = vmatpush3.msra.mxu1 %v1314_v31  ;;  %v1335_v30 = vand.u32 4294901760, %v1334_v34  ;;  %v3609_v47 = vand.u32 4294901760, %v114_v15  ;;  %v4151_v34 = vand.u32 4294901760, %v3379_v18 }
 0x17a   :  { %2282 = vmatprep.subr.mxu0 %v3376_v38  ;;  %2328 = vmatprep.subr.mxu1 %v1433_v6  ;;  %v3975_v3 = vand.u32 4294901760, %v3606_v39  ;;  %v3974_v25 = vand.u32 4294901760, %v3613_v12 }
 0x17b   :  { %2283 = vmatpush3.msra.mxu0 %v3401_v2  ;;  %2329 = vmatpush3.msra.mxu1 %v1321_v54  ;;  %4150 = vst [vmem:[#allocation42_spill] sm:$0xff] %v3609_v47  ;;  %v3620_v10 = vsub.f32 %v114_v15, %v3609_v47  ;;  %v4152_v15 = vld [vmem:[#allocation15_spill] sm:$0xff] }
 0x17c   :  { %2284 = vmatprep.subr.mxu0 %v3414_v0  ;;  %2330 = vmatprep.subr.mxu1 %v1440_v50  ;;  %v1203_v31 = vsub.f32 %v3606_v39, %v3975_v3  ;;  %v1212_v6 = vsub.f32 %v3613_v12, %v3974_v25  ;;  %v4165_v25 = vld [vmem:[#allocation28_spill] sm:$0xff]  ;;  %v4166_v3 = vld [vmem:[#allocation30_spill] sm:$0xff] }
 0x17d   :  { %2285 = vmatpush3.msra.mxu0 %v3426_v51  ;;  %2331 = vmatpush3.msra.mxu1 %v1328_v44  ;;  %v3973_v35 = vand.u32 4294901760, %v3620_v10  ;;  %v4153_v44 = vld [vmem:[#allocation12_spill] sm:$0xff] }
 0x17e   :  { %2286 = vmatprep.subr.mxu0 %v3433_v1  ;;  %2332 = vmatprep.subr.mxu1 %v1447_v62  ;;  %v1204_v54 = vand.u32 4294901760, %v1203_v31  ;;  %v1213_v41 = vand.u32 4294901760, %v1212_v6  ;;  %v4154_v62 = vld [vmem:[#allocation13_spill] sm:$0xff]  ;;  %v4156_v31 = vld [vmem:[#allocation16_spill] sm:$0xff] }
 0x17f   :  { %2287 = vmatpush3.msra.mxu0 %v3447_v48  ;;  %2333 = vmatpush3.msra.mxu1 %v1335_v30  ;;  %v1218_v57 = vsub.f32 %v3620_v10, %v3973_v35  ;;  %v4155_v30 = vld [vmem:[#allocation14_spill] sm:$0xff]  ;;  %v4157_v6 = vld [vmem:[#allocation24_spill] sm:$0xff] }
 0x180   :  { %2288 = vmatprep.subr.mxu0 %v3456_v13  ;;  %1452 = vmatmul.mubr.f32.vlgmr.msra.gmra.mxu1 %v3592_v29  ;;  %v4164_v35 = vld [vmem:[#allocation32_spill] sm:$0xff]  ;;  %v4169_v29 = vld [vmem:[#allocation31_spill] sm:$0xff] }
 0x181   :  { %2378 = vmatprep.subr.mxu1 %v3136_v17  ;;  %2289 = vmatpush3.msra.mxu0 %v3464_v32  ;;  %v1219_v50 = vand.u32 4294901760, %v1218_v57  ;;  %v4160_v57 = vld [vmem:[#allocation18_spill] sm:$0xff] }
 0x182   :  { %1457 = vmatprep.mubr.f32.mxu1 %v3601_v59  ;;  %2379 = vmatpush3.msra.mxu1 %v3146_v23  ;;  %v4168_v59 = vld [vmem:[#allocation34_spill] sm:$0xff] }
 0x183   :  { %2290 = vmatprep.subr.mxu0 %v3476_v52  ;;  %2380 = vmatprep.subr.mxu1 %v3157_v26 }
 0x184   :  { %2291 = vmatpush3.msra.mxu0 %v3485_v42  ;;  %2381 = vmatpush3.msra.mxu1 %v3162_v27 }
 0x185   :  { %2292 = vmatprep.subr.mxu0 %v3495_v63  ;;  %1459 = vmatmul.mubr.f32.gmra.mxu1 %v3609_v47  ;;  %v4167_v47 = vld [vmem:[#allocation33_spill] sm:$0xff] }
 0x186   :  { %2382 = vmatprep.subr.mxu1 %v3174_v14  ;;  %2293 = vmatpush3.msra.mxu0 %v3505_v7 }
 0x187   :  { %2383 = vmatpush3.msra.mxu1 %v3182_v11  ;;  %1710 = vmatprep.mubr.f32.mxu1 %v4151_v34  ;;  %v4159_v34 = vld [vmem:[#allocation25_spill] sm:$0xff] }
 0x188   :  { %2294 = vmatprep.subr.mxu0 %v3512_v45  ;;  %2384 = vmatprep.subr.mxu1 %v3190_v16 }
 0x189   :  { %2295 = vmatpush3.msra.mxu0 %v3522_v43  ;;  %2385 = vmatpush3.msra.mxu1 %v3196_v61 }
 0x18a   :  { %1205 = vmatmul.mubr.f32.vlgmr.msra.gmra.mxu0 %v1204_v54  ;;  %2340 = vmatprep.subr.mxu0 %v3152_v24  ;;  %v4158_v54 = vld [vmem:[#allocation17_spill] sm:$0xff] }
 0x18b   :  { %2386 = vmatprep.subr.mxu1 %v3209_v40  ;;  %1214 = vmatprep.mubr.f32.mxu0 %v1213_v41  ;;  %v4162_v41 = vld [vmem:[#allocation19_spill] sm:$0xff] }
 0x18c   :  { %2341 = vmatpush3.msra.mxu0 %v3168_v28  ;;  %2387 = vmatpush3.msra.mxu1 %v3218_v58 }
 0x18d   :  { %2342 = vmatprep.subr.mxu0 %v4152_v15  ;;  %2388 = vmatprep.subr.mxu1 %v3227_v4 }
 0x18e   :  { %2343 = vmatpush3.msra.mxu0 %v4153_v44  ;;  %2389 = vmatpush3.msra.mxu1 %v3240_v46 }
 0x18f   :  { %1220 = vmatmul.mubr.f32.gmra.mxu0 %v1219_v50  ;;  %2344 = vmatprep.subr.mxu0 %v4154_v62  ;;  %v4163_v50 = vld [vmem:[#allocation20_spill] sm:$0xff] }
 0x190   :  { %2390 = vmatprep.subr.mxu1 %v3250_v19  ;;  %2345 = vmatpush3.msra.mxu0 %v4155_v30 }
 0x191   :  { %1594 = vmatprep.mubr.f32.mxu0 %v3379_v18  ;;  %2391 = vmatpush3.msra.mxu1 %v3264_v56  ;;  %v4161_v18 = vld [vmem:[#allocation27_spill] sm:$0xff] }
 0x192   :  { %2346 = vmatprep.subr.mxu0 %v4156_v31  ;;  %2392 = vmatprep.subr.mxu1 %v3278_v55 }
 0x193   :  { %2347 = vmatpush3.msra.mxu0 %v4157_v6  ;;  %2393 = vmatpush3.msra.mxu1 %v3302_v49 }
 0x194   :  { %2348 = vmatprep.subr.mxu0 %v4158_v54  ;;  %2394 = vmatprep.subr.mxu1 %v3341_v36 }
 0x195   :  { %2349 = vmatpush3.msra.mxu0 %v4159_v34  ;;  %2395 = vmatpush3.msra.mxu1 %v3364_v20 }
 0x196   :  { %2350 = vmatprep.subr.mxu0 %v4160_v57  ;;  %2396 = vmatprep.subr.mxu1 %v3376_v38 }
 0x197   :  { %2351 = vmatpush3.msra.mxu0 %v4161_v18  ;;  %2397 = vmatpush3.msra.mxu1 %v3401_v2 }
 0x198   :  { %2352 = vmatprep.subr.mxu0 %v4162_v41  ;;  %2398 = vmatprep.subr.mxu1 %v3414_v0 }
 0x199   :  { %2353 = vmatpush3.msra.mxu0 %v4163_v50  ;;  %2399 = vmatpush3.msra.mxu1 %v3426_v51 }
 0x19a   :  { %2354 = vmatprep.subr.mxu0 %v4164_v35  ;;  %2400 = vmatprep.subr.mxu1 %v3433_v1 }
 0x19b   :  { %2355 = vmatpush3.msra.mxu0 %v4165_v25  ;;  %2401 = vmatpush3.msra.mxu1 %v3447_v48 }
 0x19c   :  { %2356 = vmatprep.subr.mxu0 %v4166_v3  ;;  %2402 = vmatprep.subr.mxu1 %v3456_v13 }
 0x19d   :  { %2357 = vmatpush3.msra.mxu0 %v4167_v47  ;;  %2403 = vmatpush3.msra.mxu1 %v3464_v32 }
 0x19e   :  { %2358 = vmatprep.subr.mxu0 %v4168_v59  ;;  %2404 = vmatprep.subr.mxu1 %v3476_v52  ;;  %v4170_v52 = vld [vmem:[#allocation22_spill] sm:$0xff] }
 0x19f   :  { %2359 = vmatpush3.msra.mxu0 %v3445_v5  ;;  %2405 = vmatpush3.msra.mxu1 %v3485_v42  ;;  %v4171_v42 = vand.u32 4294901760, %v3606_v39 }
 0x1a0   :  { %2360 = vmatprep.subr.mxu0 %v3454_v8  ;;  %2406 = vmatprep.subr.mxu1 %v3495_v63 }
 0x1a1   :  { %2361 = vmatpush3.msra.mxu0 %v3462_v9  ;;  %2407 = vmatpush3.msra.mxu1 %v3505_v7  ;;  %v4172_v9 = vand.u32 4294901760, %v3613_v12 }
 0x1a2   :  { %2362 = vmatprep.subr.mxu0 %v3474_v33  ;;  %2408 = vmatprep.subr.mxu1 %v3512_v45  ;;  %v4173_v33 = vld [vmem:[#allocation26_spill] sm:$0xff] }
 0x1a3   :  { %2363 = vmatpush3.msra.mxu0 %v4169_v29  ;;  %2409 = vmatpush3.msra.mxu1 %v3522_v43 }
 0x1a4   :  { %2364 = vmatprep.subr.mxu0 %v4170_v52  ;;  %1714 = vmatmul.mubr.f32.vlgmr.msra.gmra.mxu1 %v4171_v42  ;;  %v4174_v42 = vand.u32 4294901760, %v3620_v10 }
 0x1a5   :  { %2454 = vmatprep.subr.mxu1 %v3136_v17  ;;  %2365 = vmatpush3.msra.mxu0 %v3503_v37  ;;  %v4175_v17 = vld [vmem:[#allocation39_spill] sm:$0xff] }
 0x1a6   :  { %1721 = vmatprep.mubr.f32.mxu1 %v4172_v9  ;;  %2455 = vmatpush3.msra.mxu1 %v3146_v23  ;;  %v4176_v23 = vld [vmem:[#allocation23_spill] sm:$0xff]  ;;  %v4202_v9 = vld [vmem:[#allocation38_spill] sm:$0xff] }
 0x1a7   :  { %2366 = vmatprep.subr.mxu0 %v4173_v33  ;;  %2456 = vmatprep.subr.mxu1 %v3157_v26  ;;  %v4177_v26 = vand.u32 4294901760, %v3152_v24  ;;  %v4181_v24 = vand.u32 4294901760, %v4154_v62 }
 0x1a8   :  { %2367 = vmatpush3.msra.mxu0 %v3520_v22  ;;  %2457 = vmatpush3.msra.mxu1 %v3162_v27  ;;  %v4178_v27 = vand.u32 4294901760, %v3168_v28  ;;  %v4182_v28 = vand.u32 4294901760, %v4155_v30 }
 0x1a9   :  { %2368 = vmatprep.subr.mxu0 %v3530_v21  ;;  %1725 = vmatmul.mubr.f32.gmra.mxu1 %v4174_v42 }
 0x1aa   :  { %2458 = vmatprep.subr.mxu1 %v3174_v14  ;;  %2369 = vmatpush3.msra.mxu0 %v4175_v17  ;;  %v4179_v14 = vand.u32 4294901760, %v4152_v15 }
 0x1ab   :  { %2459 = vmatpush3.msra.mxu1 %v3182_v11  ;;  %2002 = vmatprep.mubr.f32.mxu1 %v4176_v23  ;;  %v4180_v11 = vand.u32 4294901760, %v4153_v44 }
 0x1ac   :  { %2370 = vmatprep.subr.mxu0 %v3546_v53  ;;  %2460 = vmatprep.subr.mxu1 %v3190_v16  ;;  %v4183_v16 = vand.u32 4294901760, %v4156_v31 }
 0x1ad   :  { %2371 = vmatpush3.msra.mxu0 %v3554_v60  ;;  %2461 = vmatpush3.msra.mxu1 %v3196_v61  ;;  %v4184_v61 = vand.u32 4294901760, %v4157_v6 }
 0x1ae   :  { %1597 = vmatmul.mubr.f32.vlgmr.msra.gmra.mxu0 %v3606_v39  ;;  %2416 = vmatprep.subr.mxu0 %v4177_v26  ;;  %v4208_v39 = vld [vmem:[#allocation41_spill] sm:$0xff] }
 0x1af   :  { %2462 = vmatprep.subr.mxu1 %v3209_v40  ;;  %1603 = vmatprep.mubr.f32.mxu0 %v3613_v12  ;;  %v4185_v40 = vand.u32 4294901760, %v4158_v54 }
 0x1b0   :  { %2417 = vmatpush3.msra.mxu0 %v4178_v27  ;;  %2463 = vmatpush3.msra.mxu1 %v3218_v58  ;;  %v4186_v58 = vand.u32 4294901760, %v4159_v34 }
 0x1b1   :  { %2418 = vmatprep.subr.mxu0 %v4179_v14  ;;  %2464 = vmatprep.subr.mxu1 %v3227_v4  ;;  %v4187_v4 = vand.u32 4294901760, %v4160_v57 }
 0x1b2   :  { %2419 = vmatpush3.msra.mxu0 %v4180_v11  ;;  %2465 = vmatpush3.msra.mxu1 %v3240_v46  ;;  %v4188_v46 = vand.u32 4294901760, %v4161_v18 }
 0x1b3   :  { %1606 = vmatmul.mubr.f32.gmra.mxu0 %v3620_v10  ;;  %2420 = vmatprep.subr.mxu0 %v4181_v24 }
 0x1b4   :  { %2466 = vmatprep.subr.mxu1 %v3250_v19  ;;  %2421 = vmatpush3.msra.mxu0 %v4182_v28  ;;  %v4189_v19 = vand.u32 4294901760, %v4162_v41 }
 0x1b5   :  { %1891 = vmatprep.mubr.f32.mxu0 %v4176_v23  ;;  %2467 = vmatpush3.msra.mxu1 %v3264_v56  ;;  %v4190_v56 = vand.u32 4294901760, %v4163_v50 }
 0x1b6   :  { %2422 = vmatprep.subr.mxu0 %v4183_v16  ;;  %2468 = vmatprep.subr.mxu1 %v3278_v55  ;;  %v4191_v55 = vand.u32 4294901760, %v4164_v35 }
 0x1b7   :  { %2423 = vmatpush3.msra.mxu0 %v4184_v61  ;;  %2469 = vmatpush3.msra.mxu1 %v3302_v49  ;;  %v4193_v49 = vand.u32 4294901760, %v4166_v3 }
 0x1b8   :  { %2424 = vmatprep.subr.mxu0 %v4185_v40  ;;  %2470 = vmatprep.subr.mxu1 %v3341_v36  ;;  %v4194_v36 = vand.u32 4294901760, %v4167_v47  ;;  %v4214_v47 = vand.u32 4294901760, %v3546_v53 }
 0x1b9   :  { %2425 = vmatpush3.msra.mxu0 %v4186_v58  ;;  %2471 = vmatpush3.msra.mxu1 %v3364_v20  ;;  %v4195_v20 = vand.u32 4294901760, %v4168_v59  ;;  %v4206_v59 = vld [vmem:[#allocation40_spill] sm:$0xff] }
 0x1ba   :  { %2426 = vmatprep.subr.mxu0 %v4187_v4  ;;  %2472 = vmatprep.subr.mxu1 %v3376_v38  ;;  %v4192_v38 = vand.u32 4294901760, %v4165_v25 }
 0x1bb   :  { %2427 = vmatpush3.msra.mxu0 %v4188_v46  ;;  %2473 = vmatpush3.msra.mxu1 %v3401_v2  ;;  %v4196_v2 = vld [vmem:[#allocation29_spill] sm:$0xff] }
 0x1bc   :  { %2428 = vmatprep.subr.mxu0 %v4189_v19  ;;  %2474 = vmatprep.subr.mxu1 %v3414_v0  ;;  %v4198_v0 = vld [vmem:[#allocation21_spill] sm:$0xff] }
 0x1bd   :  { %2429 = vmatpush3.msra.mxu0 %v4190_v56  ;;  %2475 = vmatpush3.msra.mxu1 %v3426_v51  ;;  %v4199_v51 = vand.u32 4294901760, %v3454_v8  ;;  %v4205_v8 = vand.u32 4294901760, %v4170_v52  ;;  %v4213_v52 = vand.u32 4294901760, %v4175_v17 }
 0x1be   :  { %2430 = vmatprep.subr.mxu0 %v4191_v55  ;;  %2476 = vmatprep.subr.mxu1 %v3433_v1  ;;  %v4197_v1 = vand.u32 4294901760, %v3445_v5  ;;  %v4204_v5 = vand.u32 4294901760, %v4169_v29  ;;  %v4211_v29 = vand.u32 4294901760, %v3530_v21 }
 0x1bf   :  { %2431 = vmatpush3.msra.mxu0 %v4192_v38  ;;  %2477 = vmatpush3.msra.mxu1 %v3447_v48 }
 0x1c0   :  { %2432 = vmatprep.subr.mxu0 %v4193_v49  ;;  %2478 = vmatprep.subr.mxu1 %v3456_v13  ;;  %v4200_v13 = vld [vmem:[#allocation11_spill] sm:$0xff] }
 0x1c1   :  { %2433 = vmatpush3.msra.mxu0 %v4194_v36  ;;  %2479 = vmatpush3.msra.mxu1 %v3464_v32  ;;  %v4201_v48 = vand.u32 4294901760, %v4200_v13  ;;  %v4203_v32 = vand.u32 4294901760, %v4202_v9 }
 0x1c2   :  { %2434 = vmatprep.subr.mxu0 %v4195_v20  ;;  %2480 = vmatprep.subr.mxu1 %v4196_v2 }
 0x1c3   :  { %2435 = vmatpush3.msra.mxu0 %v4197_v1  ;;  %2481 = vmatpush3.msra.mxu1 %v4198_v0 }
 0x1c4   :  { %2436 = vmatprep.subr.mxu0 %v4199_v51  ;;  %2482 = vmatprep.subr.mxu1 %v3495_v63  ;;  %v4207_v63 = vand.u32 4294901760, %v3503_v37  ;;  %v4215_v37 = vand.u32 4294901760, %v3554_v60 }
 0x1c5   :  { %2437 = vmatpush3.msra.mxu0 %v4201_v48  ;;  %2483 = vmatpush3.msra.mxu1 %v3505_v7  ;;  %v4209_v7 = vand.u32 4294901760, %v4173_v33 }
 0x1c6   :  { %2438 = vmatprep.subr.mxu0 %v4203_v32  ;;  %2484 = vmatprep.subr.mxu1 %v3512_v45  ;;  %v4210_v45 = vand.u32 4294901760, %v3520_v22 }
 0x1c7   :  { %2439 = vmatpush3.msra.mxu0 %v4204_v5  ;;  %2485 = vmatpush3.msra.mxu1 %v3522_v43  ;;  %v4212_v43 = vld [vmem:[#allocation42_spill] sm:$0xff] }
 0x1c8   :  { %2440 = vmatprep.subr.mxu0 %v4205_v8  ;;  %2004 = vmatmul.mubr.f32.vlgmr.msra.gmra.mxu1 %v4206_v59 }
 0x1c9   :  { %2441 = vmatpush3.msra.mxu0 %v4207_v63  ;;  %2009 = vmatprep.mubr.f32.mxu1 %v4208_v39 }
 0x1ca   :  { %2442 = vmatprep.subr.mxu0 %v4209_v7 }
 0x1cb   :  { %2443 = vmatpush3.msra.mxu0 %v4210_v45 }
 0x1cc   :  { %2444 = vmatprep.subr.mxu0 %v4211_v29  ;;  %2011 = vmatmul.mubr.f32.gmra.mxu1 %v4212_v43 }
 0x1cd   :  { %2445 = vmatpush3.msra.mxu0 %v4213_v52 }
 0x1ce   :  { %2446 = vmatprep.subr.mxu0 %v4214_v47 }
 0x1cf   :  { %2447 = vmatpush3.msra.mxu0 %v4215_v37 }
 0x1d0   :  { %1893 = vmatmul.mubr.f32.vlgmr.msra.gmra.mxu0 %v4206_v59 }
 0x1d1   :  { %1898 = vmatprep.mubr.f32.mxu0 %v4208_v39 }
 0x1d4   :  { %1900 = vmatmul.mubr.f32.gmra.mxu0 %v4212_v43  ;;  %v2106_v33 = vpop.f32.mrf.mxu1 }
 0x1d6   :  { %v2107_v21 = vpop.f32.mrf.mxu1 }
 0x1d7   :  { %v2108_v28 = vadd.f32 %v2107_v21, %v2106_v33 }
 0x1db   :  { %v2109_v12 = vpop.f32.mrf.mxu1 }
 0x1dd   :  { %v2068_v22 = vpop.f32.mrf.mxu0  ;;  %v2110_v10 = vpop.f32.mrf.mxu1 }
 0x1de   :  { %v2111_v19 = vadd.f32 %v2110_v10, %v2109_v12 }
 0x1df   :  { %v2069_v3 = vpop.f32.mrf.mxu0 }
 0x1e0   :  { %v2070_v24 = vadd.f32 %v2069_v3, %v2068_v22 }
 0x1e2   :  { %v536_v58 = vadd.f32 %v2108_v28, %v2070_v24 }
 0x1e3   :  { %v2071_v25 = vpop.f32.mrf.mxu0 }
 0x1e5   :  { %v2072_v15 = vpop.f32.mrf.mxu0 }
 0x1e6   :  { %v2073_v4 = vadd.f32 %v2072_v15, %v2071_v25 }
 0x1e8   :  { %v543_v49 = vadd.f32 %v2111_v19, %v2073_v4 }
 0x1f7   :  { %v2182_v35 = vpop.f32.mrf.mxu1 }
 0x1f9   :  { %v2183_v53 = vpop.f32.mrf.mxu1 }
 0x1fa   :  { %v2184_v36 = vadd.f32 %v2183_v53, %v2182_v35 }
 0x1fc   :  { %v2185_v62 = vpop.f32.mrf.mxu1 }
 0x1fe   :  { %v2186_v30 = vpop.f32.mrf.mxu1 }
 0x1ff   :  { %v2187_v13 = vadd.f32 %v2186_v30, %v2185_v62 }
 0x200   :  { %v2144_v44 = vpop.f32.mrf.mxu0 }
 0x202   :  { %v2145_v60 = vpop.f32.mrf.mxu0 }
 0x203   :  { %v2146_v16 = vadd.f32 %v2145_v60, %v2144_v44 }
 0x205   :  { %v2147_v31 = vpop.f32.mrf.mxu0  ;;  %v681_v56 = vadd.f32 %v2146_v16, %v536_v58 }
 0x207   :  { %v2148_v54 = vpop.f32.mrf.mxu0  ;;  %v798_v51 = vadd.f32 %v2184_v36, %v681_v56 }
 0x208   :  { %v2149_v55 = vadd.f32 %v2148_v54, %v2147_v31 }
 0x20a   :  { %v690_v0 = vadd.f32 %v2149_v55, %v543_v49 }
 0x20c   :  { %v809_v59 = vadd.f32 %v2187_v13, %v690_v0 }
 0x21b   :  { %v2258_v6 = vpop.f32.mrf.mxu1 }
 0x21d   :  { %v2259_v34 = vpop.f32.mrf.mxu1 }
 0x21e   :  { %v2260_v8 = vadd.f32 %v2259_v34, %v2258_v6 }
 0x221   :  { %v2261_v18 = vpop.f32.mrf.mxu1 }
 0x223   :  { %v2262_v50 = vpop.f32.mrf.mxu1 }
 0x224   :  { %v2263_v43 = vadd.f32 %v2262_v50, %v2261_v18 }
 0x226   :  { %v2220_v57 = vpop.f32.mrf.mxu0 }
 0x228   :  { %v2221_v41 = vpop.f32.mrf.mxu0 }
 0x229   :  { %v2222_v20 = vadd.f32 %v2221_v41, %v2220_v57 }
 0x22b   :  { %v2223_v42 = vpop.f32.mrf.mxu0  ;;  %v977_v48 = vadd.f32 %v2222_v20, %v798_v51 }
 0x22d   :  { %v2224_v23 = vpop.f32.mrf.mxu0  ;;  %v1088_v7 = vadd.f32 %v2260_v8, %v977_v48 }
 0x22e   :  { %v2225_v9 = vadd.f32 %v2224_v23, %v2223_v42 }
 0x230   :  { %v984_v39 = vadd.f32 %v2225_v9, %v809_v59 }
 0x232   :  { %v1095_v21 = vadd.f32 %v2263_v43, %v984_v39 }
 0x240   :  { %v2334_v17 = vpop.f32.mrf.mxu1 }
 0x242   :  { %v2335_v26 = vpop.f32.mrf.mxu1 }
 0x243   :  { %v2336_v33 = vadd.f32 %v2335_v26, %v2334_v17 }
 0x245   :  { %v2337_v14 = vpop.f32.mrf.mxu1 }
 0x247   :  { %v2338_v61 = vpop.f32.mrf.mxu1 }
 0x248   :  { %v2339_v35 = vadd.f32 %v2338_v61, %v2337_v14 }
 0x24a   :  { %v2296_v27 = vpop.f32.mrf.mxu0 }
 0x24c   :  { %v2297_v11 = vpop.f32.mrf.mxu0 }
 0x24d   :  { %v2298_v63 = vadd.f32 %v2297_v11, %v2296_v27 }
 0x24f   :  { %v2299_v40 = vpop.f32.mrf.mxu0  ;;  %v1207_v52 = vadd.f32 %v2298_v63, %v1088_v7 }
 0x251   :  { %v2300_v38 = vpop.f32.mrf.mxu0  ;;  %v1454_v10 = vadd.f32 %v2336_v33, %v1207_v52 }
 0x252   :  { %v2301_v47 = vadd.f32 %v2300_v38, %v2299_v40 }
 0x254   :  { %v1222_v3 = vadd.f32 %v2301_v47, %v1095_v21 }
 0x256   :  { %v1461_v60 = vadd.f32 %v2339_v35, %v1222_v3 }
 0x264   :  { %v2410_v46 = vpop.f32.mrf.mxu1 }
 0x266   :  { %v2411_v2 = vpop.f32.mrf.mxu1 }
 0x267   :  { %v2412_v62 = vadd.f32 %v2411_v2, %v2410_v46 }
 0x269   :  { %v2413_v32 = vpop.f32.mrf.mxu1 }
 0x26b   :  { %v2414_v45 = vpop.f32.mrf.mxu1 }
 0x26c   :  { %v2415_v18 = vadd.f32 %v2414_v45, %v2413_v32 }
 0x26e   :  { %v2372_v1 = vpop.f32.mrf.mxu0 }
 0x270   :  { %v2373_v5 = vpop.f32.mrf.mxu0 }
 0x271   :  { %v2374_v22 = vadd.f32 %v2373_v5, %v2372_v1 }
 0x273   :  { %v2375_v29 = vpop.f32.mrf.mxu0  ;;  %v1599_v15 = vadd.f32 %v2374_v22, %v1454_v10 }
 0x275   :  { %v2376_v12 = vpop.f32.mrf.mxu0  ;;  %v1716_v54 = vadd.f32 %v2412_v62, %v1599_v15 }
 0x276   :  { %v2377_v53 = vadd.f32 %v2376_v12, %v2375_v29 }
 0x278   :  { %v1608_v6 = vadd.f32 %v2377_v53, %v1461_v60 }
 0x27a   :  { %v1727_v26 = vadd.f32 %v2415_v18, %v1608_v6 }
 0x288   :  { %v2486_v37 = vpop.f32.mrf.mxu1 }
 0x28a   :  { %v2487_v25 = vpop.f32.mrf.mxu1 }
 0x28b   :  { %v2488_v41 = vadd.f32 %v2487_v25, %v2486_v37 }
 0x28c   :  { %v2489_v30 = vpop.f32.mrf.mxu1 }
 0x28e   :  { %v2490_v42 = vpop.f32.mrf.mxu1 }
 0x28f   :  { %v2491_v14 = vadd.f32 %v2490_v42, %v2489_v30 }
 0x290   :  { %v2448_v44 = vpop.f32.mrf.mxu0 }
 0x292   :  { %v2449_v31 = vpop.f32.mrf.mxu0 }
 0x293   :  { %v2450_v34 = vadd.f32 %v2449_v31, %v2448_v44 }
 0x294   :  { %v2451_v57 = vpop.f32.mrf.mxu0 }
 0x295   :  { %v1895_v50 = vadd.f32 %v2450_v34, %v1716_v54 }
 0x296   :  { %v2452_v17 = vpop.f32.mrf.mxu0 }
 0x297   :  { %v2006_v23 = vadd.f32 %v2488_v41, %v1895_v50  ;;  %v2453_v27 = vadd.f32 %v2452_v17, %v2451_v57 }
 0x299   :  { %2016 = vst [vmem:[#allocation7] sm:$0xff] %v2006_v23  ;;  %v1902_v11 = vadd.f32 %v2453_v27, %v1727_v26 }
 0x29b   :  { %v2013_v24 = vadd.f32 %v2491_v14, %v1902_v11 }
 0x29d   :  { %2017 = vst [vmem:[#allocation7 + $0x8] sm:$0xff] %v2013_v24 }
 0x29e   :  { %2552 = shalt.err (!%p2549_p0)
}
 0x29f   :  { %2029 = dma.vmem_to_hbm [thread:$0]  %s2024_s24, 256, %s3831_s2, [#allocation4], %s2571_s19, %s2571_s19, %s2572_s20  }
 0x2a0   :  { %2565 = dma.done.wait [#allocation4], 256  }
 0x2a1   :  { %2566 = vsyncadd [#allocation4], 4294967040 }
 0x2a2   :  { %2033 = vsyncpa [#allocation3], 1 }
 0x2a3   :  { %2034 = vsyncpa [#allocation6], 1 }
 0x2a4   :  { %2035 = vsyncpa [#allocation4], 1 }

</bundles_post_ra>
